<compile_context>
chip_gen: v5e
topology: v5e:2x2
jax: 0.10.0
libtpu: 0.0.40
codegen_flags: <defaults>
</compile_context>

<pallas_src>
import functools

import jax
import jax.numpy as jnp
from jax.experimental import pallas as pl
from jax.experimental.pallas import tpu as pltpu

EPS = 1e-5
NEG_SLOPE = 0.02


def _residual_block_kernel(x_ref, b1_ref, b2_ref, g1_ref, be1_ref,
                           g2_ref, be2_ref, s_ref, st_ref,
                           out_ref, pad_sc, y_sc):
    # x_ref   : (N, H, W*C)          f32 activation, (W, C) merged on the lane axis
    # b*_ref  : (3, (Wt+2)*C, Wt*C)  bf16 band blocks (one per kernel row), shared by all W tiles
    # g*/be*  : (1, C)               f32 BatchNorm affine parameters
    # s_ref   : (W*C, C)             per-channel one-hot "gather" selector
    # st_ref  : (C, W*C)             its transpose ("scatter" back to merged lanes)
    # pad_sc  : (N, H+2, (W+2)*C)    bf16 zero-halo scratch, reused by both convs
    # y_sc    : (N, H, W*C)          f32 raw (pre-BN) conv outputs
    N, H, WC = x_ref.shape
    C = g1_ref.shape[1]
    W = WC // C
    M = N * H
    KC = b1_ref.shape[1]          # (Wt+2)*C : contraction depth per W tile
    NC = b1_ref.shape[2]          # Wt*C     : output lanes per W tile
    wt = NC // C
    n_wt = W // wt
    inv_cnt = 1.0 / float(M * W)

    S = s_ref[...]                # (WC, C)
    ST = st_ref[...]              # (C, WC)

    def conv3x3_image(n, b_ref):
        # SAME 3x3 conv of one padded image: per W tile, 3 lane-dense matmuls
        # (one per kernel row). The band block folds the horizontal shift and
        # the Cin->Cout mixing; the W halo lanes supply the zero padding.
        # Conv bias omitted: training-mode BN's mean subtraction cancels it.
        a_pad = pad_sc[n]                                        # (H+2, (W+2)*C) bf16
        for t in range(n_wt):                                    # static W-tile loop
            lo = t * NC
            acc = jnp.dot(a_pad[0:H, lo:lo + KC], b_ref[0],
                          preferred_element_type=jnp.float32)
            for dh in (1, 2):                                    # accumulate into the result buffer
                acc += jnp.dot(a_pad[dh:dh + H, lo:lo + KC], b_ref[dh],
                               preferred_element_type=jnp.float32)
            y_sc[n, :, lo:lo + NC] = acc

    def bn_scale_shift(g_ref, be_ref):
        # Training-mode BatchNorm2d folded to one per-lane (scale, shift) pair:
        # fused sum / sum-of-squares pass; the per-channel group reduce and the
        # broadcast back over the merged (w, c) lanes are two tiny matmuls.
        y = y_sc[...].reshape(M, WC)                             # dense, contiguous reshape
        s1 = jnp.sum(y, axis=0, keepdims=True)
        s2 = jnp.sum(y * y, axis=0, keepdims=True)
        cs = jnp.dot(jnp.concatenate([s1, s2], axis=0), S,
                     preferred_element_type=jnp.float32)         # (2, C)
        mean = cs[0:1] * inv_cnt
        # TODO(synk): production two-sweep version should switch to a centered
        # (or Welford) variance; E[y^2]-mean^2 is cancellation-prone on real data.
        var = jnp.maximum(cs[1:2] * inv_cnt - mean * mean, 0.0)
        a_c = g_ref[...] * jax.lax.rsqrt(var + EPS)
        b_c = be_ref[...] - mean * a_c
        return jnp.dot(jnp.concatenate([a_c, b_c], axis=0), ST,
                       preferred_element_type=jnp.float32)       # (2, WC)

    def lrelu(z):
        return jnp.maximum(z, NEG_SLOPE * z)                     # LeakyReLU(0.02), one VALU op

    # Zero the scratch once: H-halo rows and W-halo lanes stay zero; interiors
    # are fully overwritten by each layer's activation store.
    pad_sc[...] = jnp.zeros_like(pad_sc)

    # ---- layer 1: conv ----
    for n in range(N):                                           # static batch loop
        pad_sc[n, 1:H + 1, C:C + WC] = x_ref[n].astype(pad_sc.dtype)
        conv3x3_image(n, b1_ref)

    # ---- layer 1 BN + LeakyReLU written straight into the conv-2 scratch,
    #      then layer 2 conv ----
    ab1 = bn_scale_shift(g1_ref, be1_ref)
    for n in range(N):
        z = lrelu(y_sc[n] * ab1[0:1] + ab1[1:2])
        pad_sc[n, 1:H + 1, C:C + WC] = z.astype(pad_sc.dtype)
        conv3x3_image(n, b2_ref)

    # ---- layer 2 BN + LeakyReLU + residual add (against un-rounded f32 x) ----
    ab2 = bn_scale_shift(g2_ref, be2_ref)
    for n in range(N):
        z = lrelu(y_sc[n] * ab2[0:1] + ab2[1:2])
        out_ref[n] = (x_ref[n] + z).astype(out_ref.dtype)


def _pick_w_tile(width, channels, target_lanes=128):
    """Largest divisor of `width` with wt*C <= target_lanes (>= 1).

    128 output lanes fills the v5e MXU and gives unmasked stores; pass 256 on
    v6e/v7x when the shape allows."""
    wt = max(1, min(width, target_lanes // max(channels, 1)))
    while width % wt:
        wt -= 1
    return wt


def _band_blocks(w9, wt, dtype=jnp.bfloat16):
    """(9, Cin, Cout) flattened-HWIO conv weight -> (3, (wt+2)*C, wt*C) band blocks.

    B[kh][u*C+ci, w*C+co] = w[kh, u-w, ci, co] for 0 <= u-w < 3, else 0: the
    horizontal shift and Cin->Cout mixing of a SAME 3x3 conv folded into one
    K=(wt+2)*C contraction per kernel row; identical for every W tile because
    the W zero-padding lives in the activation scratch's halo lanes."""
    C = w9.shape[-1]
    w = w9.reshape(3, 3, C, C)                                  # (kh, kw, ci, co)
    u = jnp.arange(wt + 2)[None, :, None]
    wo = jnp.arange(wt)[None, None, :]
    kw = jnp.arange(3)[:, None, None]
    T = (u == wo + kw).astype(jnp.float32)                      # (3, wt+2, wt)
    B = jnp.einsum("kuw,hkio->huiwo", T, w.astype(jnp.float32),
                   precision=jax.lax.Precision.HIGHEST)         # (3, wt+2, C, wt, C)
    return B.reshape(3, (wt + 2) * C, wt * C).astype(dtype)


def pack_params(params, width, *, target_lanes=128):
    """One-time parameter packing, hoisted out of the per-forward path."""
    C = params["g1"].shape[1]
    wt = _pick_w_tile(width, C, target_lanes)
    sel = jnp.tile(jnp.eye(C, dtype=jnp.float32), (width, 1))   # (W*C, C)
    # Conv biases intentionally not packed: training-mode BN subtracts the
    # per-channel batch mean, which cancels a per-channel bias exactly.
    return dict(b1=_band_blocks(params["w1"], wt),
                b2=_band_blocks(params["w2"], wt),
                sel=sel, sel_t=jnp.transpose(sel),
                g1=params["g1"], be1=params["be1"],
                g2=params["g2"], be2=params["be2"])


def _vmem_limit_bytes():
    # Budget ~half the running generation's physical VMEM (v7x: 64 MiB total),
    # capped at 64 MiB; the toy shape needs well under 1 MiB.
    try:
        cap = getattr(pltpu.get_tpu_info(), "vmem_capacity_bytes",
                      128 * 1024 * 1024)
    except Exception:
        cap = 128 * 1024 * 1024
    return int(min(cap // 2, 64 * 1024 * 1024))


@jax.jit
def residual_block(x_nchw, packed):
    """x_nchw: (N, C, H, W) float32, same layout as the PyTorch module."""
    N, C, H, W = x_nchw.shape
    WC = W * C
    # TODO(synk): for production, accept NHWC at the module boundary; these two
    # wrapper transposes are full HBM passes that rival the kernel's traffic.
    x_m = jnp.transpose(x_nchw, (0, 2, 3, 1)).reshape(N, H, WC)

    out_m = pl.pallas_call(
        _residual_block_kernel,
        out_shape=jax.ShapeDtypeStruct((N, H, WC), x_nchw.dtype),
        in_specs=[pl.BlockSpec(memory_space=pltpu.MemorySpace.VMEM)] * 9,
        out_specs=pl.BlockSpec(memory_space=pltpu.MemorySpace.VMEM),
        scratch_shapes=[pltpu.VMEM((N, H + 2, (W + 2) * C), jnp.bfloat16),
                        pltpu.VMEM((N, H, WC), jnp.float32)],
        compiler_params=pltpu.CompilerParams(
            vmem_limit_bytes=_vmem_limit_bytes()),
    )(x_m, packed["b1"], packed["b2"], packed["g1"], packed["be1"],
      packed["g2"], packed["be2"], packed["sel"], packed["sel_t"])

    # TODO(synk): for production H/W/C this grid-less kernel must become a
    # two-sweep, H-strip-tiled pipeline (sweep 1: conv + per-channel sum/sumsq
    # accumulated along a trailing 'arbitrary' grid axis; sweep 2: normalize +
    # conv2 + residual), with a leading 'parallel' N/strip axis for v7x's two
    # TensorCores, strip heights budgeted against per-generation VMEM, and
    # centered/Welford BN statistics.
    return jnp.transpose(out_m.reshape(N, H, W, C), (0, 3, 1, 2))


def init_params(key, channels):
    """Deterministic synthetic parameters (shapes match nn.Conv2d/BatchNorm2d)."""
    k1, k2, k3, k4 = jax.random.split(key, 4)
    # conv weights as flattened HWIO: (3*3, Cin, Cout)
    w1 = jax.random.normal(k1, (9, channels, channels), jnp.float32) * 0.1
    w2 = jax.random.normal(k2, (9, channels, channels), jnp.float32) * 0.1
    # conv biases exist in the module (used by the reference); the kernel drops
    # them because training-mode BN cancels them exactly.
    b1 = jax.random.normal(k3, (1, channels), jnp.float32) * 0.1
    b2 = jax.random.normal(k4, (1, channels), jnp.float32) * 0.1
    # BatchNorm affine params at their PyTorch defaults (gamma=1, beta=0)
    g1 = jnp.ones((1, channels), jnp.float32)
    be1 = jnp.zeros((1, channels), jnp.float32)
    g2 = jnp.ones((1, channels), jnp.float32)
    be2 = jnp.zeros((1, channels), jnp.float32)
    return dict(w1=w1, b1=b1, g1=g1, be1=be1, w2=w2, b2=b2, g2=g2, be2=be2)


def _reference(x_nchw, params):
    """Pure-JAX reference of the PyTorch forward (training-mode BN, WITH biases)."""
    x = jnp.transpose(x_nchw, (0, 2, 3, 1))
    C = x.shape[-1]

    def layer(y, w9, b, g, be):
        w = w9.reshape(3, 3, C, C)
        z = jax.lax.conv_general_dilated(
            y, w, window_strides=(1, 1), padding="SAME",
            dimension_numbers=("NHWC", "HWIO", "NHWC")) + b.reshape(1, 1, 1, C)
        mean = z.mean(axis=(0, 1, 2), keepdims=True)
        var = ((z - mean) ** 2).mean(axis=(0, 1, 2), keepdims=True)
        zn = (z - mean) * jax.lax.rsqrt(var + EPS)
        zn = zn * g.reshape(1, 1, 1, C) + be.reshape(1, 1, 1, C)
        return jnp.where(zn > 0, zn, NEG_SLOPE * zn)

    y = layer(x, params["w1"], params["b1"], params["g1"], params["be1"])
    y = layer(y, params["w2"], params["b2"], params["g2"], params["be2"])
    return jnp.transpose(x + y, (0, 3, 1, 2))


if __name__ == "__main__":
    key = jax.random.PRNGKey(0)
    kx, kp = jax.random.split(key)

    N, C, H, W = 2, 4, 16, 16
    x = jax.random.normal(kx, (N, C, H, W), jnp.float32)
    params = init_params(kp, C)
    packed = pack_params(params, W)          # hoisted out of the forward path

    out = jax.block_until_ready(residual_block(x, packed))
    ref = jax.block_until_ready(_reference(x, params))

    assert out.shape == (N, C, H, W)
    err = float(jnp.max(jnp.abs(out - ref)))
    # bf16 MXU operands (per perf review) -> looser tolerance than the f32 kernel.
    assert jnp.allclose(out, ref, rtol=5e-2, atol=5e-2), f"max abs err {err}"

    print("KERNEL_OK")
</pallas_src>

<mosaic_0001>
module attributes {stable_mosaic.version = 11 : i64} {
  func.func @_residual_block_kernel(%arg0: memref<2x16x64xf32, #tpu.memory_space<vmem>>, %arg1: memref<3x72x64xbf16, #tpu.memory_space<vmem>>, %arg2: memref<3x72x64xbf16, #tpu.memory_space<vmem>>, %arg3: memref<1x4xf32, #tpu.memory_space<vmem>>, %arg4: memref<1x4xf32, #tpu.memory_space<vmem>>, %arg5: memref<1x4xf32, #tpu.memory_space<vmem>>, %arg6: memref<1x4xf32, #tpu.memory_space<vmem>>, %arg7: memref<64x4xf32, #tpu.memory_space<vmem>>, %arg8: memref<4x64xf32, #tpu.memory_space<vmem>>, %arg9: memref<2x16x64xf32, #tpu.memory_space<vmem>>, %arg10: memref<2x18x72xbf16, #tpu.memory_space<vmem>>, %arg11: memref<2x16x64xf32, #tpu.memory_space<vmem>>) attributes {dimension_semantics = [], scalar_prefetch = 0 : i64, scratch_operands = 2 : i64, tpu.core_type = #tpu.core_type<tc>} {
    %c0 = arith.constant 0 : index
    %c0_0 = arith.constant 0 : index
    %0 = vector.load %arg7[%c0, %c0_0] : memref<64x4xf32, #tpu.memory_space<vmem>>, vector<64x4xf32>
    %c0_1 = arith.constant 0 : index
    %c0_2 = arith.constant 0 : index
    %1 = vector.load %arg8[%c0_1, %c0_2] : memref<4x64xf32, #tpu.memory_space<vmem>>, vector<4x64xf32>
    %cst = arith.constant 0.000000e+00 : bf16
    %2 = vector.broadcast %cst : bf16 to vector<2x18x72xbf16>
    %c0_3 = arith.constant 0 : index
    %c0_4 = arith.constant 0 : index
    %c0_5 = arith.constant 0 : index
    %3 = vector.load %arg10[%c0_3, %c0_4, %c0_5] : memref<2x18x72xbf16, #tpu.memory_space<vmem>>, vector<2x18x72xbf16>
    tpu.vector_store %arg10[%c0_3, %c0_4, %c0_5], %2 {strides = array<i32>} : memref<2x18x72xbf16, #tpu.memory_space<vmem>>, vector<2x18x72xbf16>,
    %c0_6 = arith.constant 0 : index
    %c0_7 = arith.constant 0 : index
    %c0_8 = arith.constant 0 : index
    %4 = vector.load %arg0[%c0_6, %c0_7, %c0_8] : memref<2x16x64xf32, #tpu.memory_space<vmem>>, vector<1x16x64xf32>
    %5 = vector.shape_cast %4 : vector<1x16x64xf32> to vector<16x64xf32>
    %6 = arith.truncf %5 : vector<16x64xf32> to vector<16x64xbf16>
    %c0_9 = arith.constant 0 : index
    %c1 = arith.constant 1 : index
    %c4 = arith.constant 4 : index
    %7 = vector.load %arg10[%c0_9, %c1, %c4] : memref<2x18x72xbf16, #tpu.memory_space<vmem>>, vector<1x16x64xbf16>
    %8 = vector.shape_cast %7 : vector<1x16x64xbf16> to vector<16x64xbf16>
    %9 = vector.shape_cast %6 : vector<16x64xbf16> to vector<1x16x64xbf16>
    tpu.vector_store %arg10[%c0_9, %c1, %c4], %9 {strides = array<i32>} : memref<2x18x72xbf16, #tpu.memory_space<vmem>>, vector<1x16x64xbf16>,
    %c0_10 = arith.constant 0 : index
    %c0_11 = arith.constant 0 : index
    %c0_12 = arith.constant 0 : index
    %10 = vector.load %arg10[%c0_10, %c0_11, %c0_12] : memref<2x18x72xbf16, #tpu.memory_space<vmem>>, vector<1x18x72xbf16>
    %11 = vector.shape_cast %10 : vector<1x18x72xbf16> to vector<18x72xbf16>
    %12 = vector.extract_strided_slice %11 {offsets = [0, 0], sizes = [16, 72], strides = [1, 1]} : vector<18x72xbf16> to vector<16x72xbf16>
    %c0_13 = arith.constant 0 : index
    %c0_14 = arith.constant 0 : index
    %c0_15 = arith.constant 0 : index
    %13 = vector.load %arg1[%c0_13, %c0_14, %c0_15] : memref<3x72x64xbf16, #tpu.memory_space<vmem>>, vector<1x72x64xbf16>
    %14 = vector.shape_cast %13 : vector<1x72x64xbf16> to vector<72x64xbf16>
    %cst_16 = arith.constant dense<0.000000e+00> : vector<16x64xf32>
    %15 = tpu.matmul %12, %14, %cst_16 {dimension_numbers = #tpu.dot_dimension_numbers<[1], [0], [0], [1], [0, 0, 1, 1], [], []>} : vector<16x72xbf16>, vector<72x64xbf16>, vector<16x64xf32> -> vector<16x64xf32>
    %16 = vector.extract_strided_slice %11 {offsets = [1, 0], sizes = [16, 72], strides = [1, 1]} : vector<18x72xbf16> to vector<16x72xbf16>
    %c1_17 = arith.constant 1 : index
    %c0_18 = arith.constant 0 : index
    %c0_19 = arith.constant 0 : index
    %17 = vector.load %arg1[%c1_17, %c0_18, %c0_19] : memref<3x72x64xbf16, #tpu.memory_space<vmem>>, vector<1x72x64xbf16>
    %18 = vector.shape_cast %17 : vector<1x72x64xbf16> to vector<72x64xbf16>
    %cst_20 = arith.constant dense<0.000000e+00> : vector<16x64xf32>
    %19 = tpu.matmul %16, %18, %cst_20 {dimension_numbers = #tpu.dot_dimension_numbers<[1], [0], [0], [1], [0, 0, 1, 1], [], []>} : vector<16x72xbf16>, vector<72x64xbf16>, vector<16x64xf32> -> vector<16x64xf32>
    %20 = arith.addf %15, %19 : vector<16x64xf32>
    %21 = vector.extract_strided_slice %11 {offsets = [2, 0], sizes = [16, 72], strides = [1, 1]} : vector<18x72xbf16> to vector<16x72xbf16>
    %c2 = arith.constant 2 : index
    %c0_21 = arith.constant 0 : index
    %c0_22 = arith.constant 0 : index
    %22 = vector.load %arg1[%c2, %c0_21, %c0_22] : memref<3x72x64xbf16, #tpu.memory_space<vmem>>, vector<1x72x64xbf16>
    %23 = vector.shape_cast %22 : vector<1x72x64xbf16> to vector<72x64xbf16>
    %cst_23 = arith.constant dense<0.000000e+00> : vector<16x64xf32>
    %24 = tpu.matmul %21, %23, %cst_23 {dimension_numbers = #tpu.dot_dimension_numbers<[1], [0], [0], [1], [0, 0, 1, 1], [], []>} : vector<16x72xbf16>, vector<72x64xbf16>, vector<16x64xf32> -> vector<16x64xf32>
    %25 = arith.addf %20, %24 : vector<16x64xf32>
    %c0_24 = arith.constant 0 : index
    %c0_25 = arith.constant 0 : index
    %c0_26 = arith.constant 0 : index
    %26 = vector.load %arg11[%c0_24, %c0_25, %c0_26] : memref<2x16x64xf32, #tpu.memory_space<vmem>>, vector<1x16x64xf32>
    %27 = vector.shape_cast %26 : vector<1x16x64xf32> to vector<16x64xf32>
    %28 = vector.shape_cast %25 : vector<16x64xf32> to vector<1x16x64xf32>
    tpu.vector_store %arg11[%c0_24, %c0_25, %c0_26], %28 {strides = array<i32>} : memref<2x16x64xf32, #tpu.memory_space<vmem>>, vector<1x16x64xf32>,
    %c1_27 = arith.constant 1 : index
    %c0_28 = arith.constant 0 : index
    %c0_29 = arith.constant 0 : index
    %29 = vector.load %arg0[%c1_27, %c0_28, %c0_29] : memref<2x16x64xf32, #tpu.memory_space<vmem>>, vector<1x16x64xf32>
    %30 = vector.shape_cast %29 : vector<1x16x64xf32> to vector<16x64xf32>
    %31 = arith.truncf %30 : vector<16x64xf32> to vector<16x64xbf16>
    %c1_30 = arith.constant 1 : index
    %c1_31 = arith.constant 1 : index
    %c4_32 = arith.constant 4 : index
    %32 = vector.load %arg10[%c1_30, %c1_31, %c4_32] : memref<2x18x72xbf16, #tpu.memory_space<vmem>>, vector<1x16x64xbf16>
    %33 = vector.shape_cast %32 : vector<1x16x64xbf16> to vector<16x64xbf16>
    %34 = vector.shape_cast %31 : vector<16x64xbf16> to vector<1x16x64xbf16>
    tpu.vector_store %arg10[%c1_30, %c1_31, %c4_32], %34 {strides = array<i32>} : memref<2x18x72xbf16, #tpu.memory_space<vmem>>, vector<1x16x64xbf16>,
    %c1_33 = arith.constant 1 : index
    %c0_34 = arith.constant 0 : index
    %c0_35 = arith.constant 0 : index
    %35 = vector.load %arg10[%c1_33, %c0_34, %c0_35] : memref<2x18x72xbf16, #tpu.memory_space<vmem>>, vector<1x18x72xbf16>
    %36 = vector.shape_cast %35 : vector<1x18x72xbf16> to vector<18x72xbf16>
    %37 = vector.extract_strided_slice %36 {offsets = [0, 0], sizes = [16, 72], strides = [1, 1]} : vector<18x72xbf16> to vector<16x72xbf16>
    %c0_36 = arith.constant 0 : index
    %c0_37 = arith.constant 0 : index
    %c0_38 = arith.constant 0 : index
    %38 = vector.load %arg1[%c0_36, %c0_37, %c0_38] : memref<3x72x64xbf16, #tpu.memory_space<vmem>>, vector<1x72x64xbf16>
    %39 = vector.shape_cast %38 : vector<1x72x64xbf16> to vector<72x64xbf16>
    %cst_39 = arith.constant dense<0.000000e+00> : vector<16x64xf32>
    %40 = tpu.matmul %37, %39, %cst_39 {dimension_numbers = #tpu.dot_dimension_numbers<[1], [0], [0], [1], [0, 0, 1, 1], [], []>} : vector<16x72xbf16>, vector<72x64xbf16>, vector<16x64xf32> -> vector<16x64xf32>
    %41 = vector.extract_strided_slice %36 {offsets = [1, 0], sizes = [16, 72], strides = [1, 1]} : vector<18x72xbf16> to vector<16x72xbf16>
    %c1_40 = arith.constant 1 : index
    %c0_41 = arith.constant 0 : index
    %c0_42 = arith.constant 0 : index
    %42 = vector.load %arg1[%c1_40, %c0_41, %c0_42] : memref<3x72x64xbf16, #tpu.memory_space<vmem>>, vector<1x72x64xbf16>
    %43 = vector.shape_cast %42 : vector<1x72x64xbf16> to vector<72x64xbf16>
    %cst_43 = arith.constant dense<0.000000e+00> : vector<16x64xf32>
    %44 = tpu.matmul %41, %43, %cst_43 {dimension_numbers = #tpu.dot_dimension_numbers<[1], [0], [0], [1], [0, 0, 1, 1], [], []>} : vector<16x72xbf16>, vector<72x64xbf16>, vector<16x64xf32> -> vector<16x64xf32>
    %45 = arith.addf %40, %44 : vector<16x64xf32>
    %46 = vector.extract_strided_slice %36 {offsets = [2, 0], sizes = [16, 72], strides = [1, 1]} : vector<18x72xbf16> to vector<16x72xbf16>
    %c2_44 = arith.constant 2 : index
    %c0_45 = arith.constant 0 : index
    %c0_46 = arith.constant 0 : index
    %47 = vector.load %arg1[%c2_44, %c0_45, %c0_46] : memref<3x72x64xbf16, #tpu.memory_space<vmem>>, vector<1x72x64xbf16>
    %48 = vector.shape_cast %47 : vector<1x72x64xbf16> to vector<72x64xbf16>
    %cst_47 = arith.constant dense<0.000000e+00> : vector<16x64xf32>
    %49 = tpu.matmul %46, %48, %cst_47 {dimension_numbers = #tpu.dot_dimension_numbers<[1], [0], [0], [1], [0, 0, 1, 1], [], []>} : vector<16x72xbf16>, vector<72x64xbf16>, vector<16x64xf32> -> vector<16x64xf32>
    %50 = arith.addf %45, %49 : vector<16x64xf32>
    %c1_48 = arith.constant 1 : index
    %c0_49 = arith.constant 0 : index
    %c0_50 = arith.constant 0 : index
    %51 = vector.load %arg11[%c1_48, %c0_49, %c0_50] : memref<2x16x64xf32, #tpu.memory_space<vmem>>, vector<1x16x64xf32>
    %52 = vector.shape_cast %51 : vector<1x16x64xf32> to vector<16x64xf32>
    %53 = vector.shape_cast %50 : vector<16x64xf32> to vector<1x16x64xf32>
    tpu.vector_store %arg11[%c1_48, %c0_49, %c0_50], %53 {strides = array<i32>} : memref<2x16x64xf32, #tpu.memory_space<vmem>>, vector<1x16x64xf32>,
    %c0_51 = arith.constant 0 : index
    %c0_52 = arith.constant 0 : index
    %c0_53 = arith.constant 0 : index
    %54 = vector.load %arg11[%c0_51, %c0_52, %c0_53] : memref<2x16x64xf32, #tpu.memory_space<vmem>>, vector<2x16x64xf32>
    %55 = vector.shape_cast %54 : vector<2x16x64xf32> to vector<32x64xf32>
    %cst_54 = arith.constant dense<0.000000e+00> : vector<64xf32>
    %56 = vector.multi_reduction <add>, %55, %cst_54 [0] : vector<32x64xf32> to vector<64xf32>
    %57 = vector.shape_cast %56 : vector<64xf32> to vector<1x64xf32>
    %58 = arith.mulf %55, %55 : vector<32x64xf32>
    %cst_55 = arith.constant dense<0.000000e+00> : vector<64xf32>
    %59 = vector.multi_reduction <add>, %58, %cst_55 [0] : vector<32x64xf32> to vector<64xf32>
    %60 = vector.shape_cast %59 : vector<64xf32> to vector<1x64xf32>
    %61 = tpu.concatenate %57, %60 in 0 : vector<1x64xf32>, vector<1x64xf32> -> vector<2x64xf32>
    %cst_56 = arith.constant dense<0.000000e+00> : vector<2x4xf32>
    %62 = tpu.matmul %61, %0, %cst_56 {dimension_numbers = #tpu.dot_dimension_numbers<[1], [0], [0], [1], [0, 0, 1, 1], [], []>} : vector<2x64xf32>, vector<64x4xf32>, vector<2x4xf32> -> vector<2x4xf32>
    %63 = vector.extract_strided_slice %62 {offsets = [0, 0], sizes = [1, 4], strides = [1, 1]} : vector<2x4xf32> to vector<1x4xf32>
    %cst_57 = arith.constant 0.001953125 : f32
    %64 = vector.broadcast %cst_57 : f32 to vector<1x4xf32>
    %65 = arith.mulf %63, %64 : vector<1x4xf32>
    %66 = vector.extract_strided_slice %62 {offsets = [1, 0], sizes = [1, 4], strides = [1, 1]} : vector<2x4xf32> to vector<1x4xf32>
    %cst_58 = arith.constant 0.001953125 : f32
    %67 = vector.broadcast %cst_58 : f32 to vector<1x4xf32>
    %68 = arith.mulf %66, %67 : vector<1x4xf32>
    %69 = arith.mulf %65, %65 : vector<1x4xf32>
    %70 = arith.subf %68, %69 : vector<1x4xf32>
    %cst_59 = arith.constant 0.000000e+00 : f32
    %71 = vector.broadcast %cst_59 : f32 to vector<1x4xf32>
    %72 = arith.maximumf %70, %71 : vector<1x4xf32>
    %c0_60 = arith.constant 0 : index
    %c0_61 = arith.constant 0 : index
    %73 = vector.load %arg3[%c0_60, %c0_61] : memref<1x4xf32, #tpu.memory_space<vmem>>, vector<1x4xf32>
    %cst_62 = arith.constant 9.99999974E-6 : f32
    %74 = vector.broadcast %cst_62 : f32 to vector<1x4xf32>
    %75 = arith.addf %72, %74 : vector<1x4xf32>
    %76 = math.rsqrt %75 : vector<1x4xf32>
    %77 = arith.mulf %73, %76 : vector<1x4xf32>
    %c0_63 = arith.constant 0 : index
    %c0_64 = arith.constant 0 : index
    %78 = vector.load %arg4[%c0_63, %c0_64] : memref<1x4xf32, #tpu.memory_space<vmem>>, vector<1x4xf32>
    %79 = arith.mulf %65, %77 : vector<1x4xf32>
    %80 = arith.subf %78, %79 : vector<1x4xf32>
    %81 = tpu.concatenate %77, %80 in 0 : vector<1x4xf32>, vector<1x4xf32> -> vector<2x4xf32>
    %cst_65 = arith.constant dense<0.000000e+00> : vector<2x64xf32>
    %82 = tpu.matmul %81, %1, %cst_65 {dimension_numbers = #tpu.dot_dimension_numbers<[1], [0], [0], [1], [0, 0, 1, 1], [], []>} : vector<2x4xf32>, vector<4x64xf32>, vector<2x64xf32> -> vector<2x64xf32>
    %c0_66 = arith.constant 0 : index
    %c0_67 = arith.constant 0 : index
    %c0_68 = arith.constant 0 : index
    %83 = vector.load %arg11[%c0_66, %c0_67, %c0_68] : memref<2x16x64xf32, #tpu.memory_space<vmem>>, vector<1x16x64xf32>
    %84 = vector.shape_cast %83 : vector<1x16x64xf32> to vector<16x64xf32>
    %85 = vector.extract_strided_slice %82 {offsets = [0, 0], sizes = [1, 64], strides = [1, 1]} : vector<2x64xf32> to vector<1x64xf32>
    %86 = vector.broadcast %85 : vector<1x64xf32> to vector<16x64xf32>
    %87 = arith.mulf %84, %86 : vector<16x64xf32>
    %88 = vector.extract_strided_slice %82 {offsets = [1, 0], sizes = [1, 64], strides = [1, 1]} : vector<2x64xf32> to vector<1x64xf32>
    %89 = vector.broadcast %88 : vector<1x64xf32> to vector<16x64xf32>
    %90 = arith.addf %87, %89 : vector<16x64xf32>
    %cst_69 = arith.constant 2.000000e-02 : f32
    %91 = vector.broadcast %cst_69 : f32 to vector<16x64xf32>
    %92 = arith.mulf %91, %90 : vector<16x64xf32>
    %93 = arith.maximumf %90, %92 : vector<16x64xf32>
    %94 = arith.truncf %93 : vector<16x64xf32> to vector<16x64xbf16>
    %c0_70 = arith.constant 0 : index
    %c1_71 = arith.constant 1 : index
    %c4_72 = arith.constant 4 : index
    %95 = vector.load %arg10[%c0_70, %c1_71, %c4_72] : memref<2x18x72xbf16, #tpu.memory_space<vmem>>, vector<1x16x64xbf16>
    %96 = vector.shape_cast %95 : vector<1x16x64xbf16> to vector<16x64xbf16>
    %97 = vector.shape_cast %94 : vector<16x64xbf16> to vector<1x16x64xbf16>
    tpu.vector_store %arg10[%c0_70, %c1_71, %c4_72], %97 {strides = array<i32>} : memref<2x18x72xbf16, #tpu.memory_space<vmem>>, vector<1x16x64xbf16>,
    %c0_73 = arith.constant 0 : index
    %c0_74 = arith.constant 0 : index
    %c0_75 = arith.constant 0 : index
    %98 = vector.load %arg10[%c0_73, %c0_74, %c0_75] : memref<2x18x72xbf16, #tpu.memory_space<vmem>>, vector<1x18x72xbf16>
    %99 = vector.shape_cast %98 : vector<1x18x72xbf16> to vector<18x72xbf16>
    %100 = vector.extract_strided_slice %99 {offsets = [0, 0], sizes = [16, 72], strides = [1, 1]} : vector<18x72xbf16> to vector<16x72xbf16>
    %c0_76 = arith.constant 0 : index
    %c0_77 = arith.constant 0 : index
    %c0_78 = arith.constant 0 : index
    %101 = vector.load %arg2[%c0_76, %c0_77, %c0_78] : memref<3x72x64xbf16, #tpu.memory_space<vmem>>, vector<1x72x64xbf16>
    %102 = vector.shape_cast %101 : vector<1x72x64xbf16> to vector<72x64xbf16>
    %cst_79 = arith.constant dense<0.000000e+00> : vector<16x64xf32>
    %103 = tpu.matmul %100, %102, %cst_79 {dimension_numbers = #tpu.dot_dimension_numbers<[1], [0], [0], [1], [0, 0, 1, 1], [], []>} : vector<16x72xbf16>, vector<72x64xbf16>, vector<16x64xf32> -> vector<16x64xf32>
    %104 = vector.extract_strided_slice %99 {offsets = [1, 0], sizes = [16, 72], strides = [1, 1]} : vector<18x72xbf16> to vector<16x72xbf16>
    %c1_80 = arith.constant 1 : index
    %c0_81 = arith.constant 0 : index
    %c0_82 = arith.constant 0 : index
    %105 = vector.load %arg2[%c1_80, %c0_81, %c0_82] : memref<3x72x64xbf16, #tpu.memory_space<vmem>>, vector<1x72x64xbf16>
    %106 = vector.shape_cast %105 : vector<1x72x64xbf16> to vector<72x64xbf16>
    %cst_83 = arith.constant dense<0.000000e+00> : vector<16x64xf32>
    %107 = tpu.matmul %104, %106, %cst_83 {dimension_numbers = #tpu.dot_dimension_numbers<[1], [0], [0], [1], [0, 0, 1, 1], [], []>} : vector<16x72xbf16>, vector<72x64xbf16>, vector<16x64xf32> -> vector<16x64xf32>
    %108 = arith.addf %103, %107 : vector<16x64xf32>
    %109 = vector.extract_strided_slice %99 {offsets = [2, 0], sizes = [16, 72], strides = [1, 1]} : vector<18x72xbf16> to vector<16x72xbf16>
    %c2_84 = arith.constant 2 : index
    %c0_85 = arith.constant 0 : index
    %c0_86 = arith.constant 0 : index
    %110 = vector.load %arg2[%c2_84, %c0_85, %c0_86] : memref<3x72x64xbf16, #tpu.memory_space<vmem>>, vector<1x72x64xbf16>
    %111 = vector.shape_cast %110 : vector<1x72x64xbf16> to vector<72x64xbf16>
    %cst_87 = arith.constant dense<0.000000e+00> : vector<16x64xf32>
    %112 = tpu.matmul %109, %111, %cst_87 {dimension_numbers = #tpu.dot_dimension_numbers<[1], [0], [0], [1], [0, 0, 1, 1], [], []>} : vector<16x72xbf16>, vector<72x64xbf16>, vector<16x64xf32> -> vector<16x64xf32>
    %113 = arith.addf %108, %112 : vector<16x64xf32>
    %c0_88 = arith.constant 0 : index
    %c0_89 = arith.constant 0 : index
    %c0_90 = arith.constant 0 : index
    %114 = vector.load %arg11[%c0_88, %c0_89, %c0_90] : memref<2x16x64xf32, #tpu.memory_space<vmem>>, vector<1x16x64xf32>
    %115 = vector.shape_cast %114 : vector<1x16x64xf32> to vector<16x64xf32>
    %116 = vector.shape_cast %113 : vector<16x64xf32> to vector<1x16x64xf32>
    tpu.vector_store %arg11[%c0_88, %c0_89, %c0_90], %116 {strides = array<i32>} : memref<2x16x64xf32, #tpu.memory_space<vmem>>, vector<1x16x64xf32>,
    %c1_91 = arith.constant 1 : index
    %c0_92 = arith.constant 0 : index
    %c0_93 = arith.constant 0 : index
    %117 = vector.load %arg11[%c1_91, %c0_92, %c0_93] : memref<2x16x64xf32, #tpu.memory_space<vmem>>, vector<1x16x64xf32>
    %118 = vector.shape_cast %117 : vector<1x16x64xf32> to vector<16x64xf32>
    %119 = vector.extract_strided_slice %82 {offsets = [0, 0], sizes = [1, 64], strides = [1, 1]} : vector<2x64xf32> to vector<1x64xf32>
    %120 = vector.broadcast %119 : vector<1x64xf32> to vector<16x64xf32>
    %121 = arith.mulf %118, %120 : vector<16x64xf32>
    %122 = vector.extract_strided_slice %82 {offsets = [1, 0], sizes = [1, 64], strides = [1, 1]} : vector<2x64xf32> to vector<1x64xf32>
    %123 = vector.broadcast %122 : vector<1x64xf32> to vector<16x64xf32>
    %124 = arith.addf %121, %123 : vector<16x64xf32>
    %cst_94 = arith.constant 2.000000e-02 : f32
    %125 = vector.broadcast %cst_94 : f32 to vector<16x64xf32>
    %126 = arith.mulf %125, %124 : vector<16x64xf32>
    %127 = arith.maximumf %124, %126 : vector<16x64xf32>
    %128 = arith.truncf %127 : vector<16x64xf32> to vector<16x64xbf16>
    %c1_95 = arith.constant 1 : index
    %c1_96 = arith.constant 1 : index
    %c4_97 = arith.constant 4 : index
    %129 = vector.load %arg10[%c1_95, %c1_96, %c4_97] : memref<2x18x72xbf16, #tpu.memory_space<vmem>>, vector<1x16x64xbf16>
    %130 = vector.shape_cast %129 : vector<1x16x64xbf16> to vector<16x64xbf16>
    %131 = vector.shape_cast %128 : vector<16x64xbf16> to vector<1x16x64xbf16>
    tpu.vector_store %arg10[%c1_95, %c1_96, %c4_97], %131 {strides = array<i32>} : memref<2x18x72xbf16, #tpu.memory_space<vmem>>, vector<1x16x64xbf16>,
    %c1_98 = arith.constant 1 : index
    %c0_99 = arith.constant 0 : index
    %c0_100 = arith.constant 0 : index
    %132 = vector.load %arg10[%c1_98, %c0_99, %c0_100] : memref<2x18x72xbf16, #tpu.memory_space<vmem>>, vector<1x18x72xbf16>
    %133 = vector.shape_cast %132 : vector<1x18x72xbf16> to vector<18x72xbf16>
    %134 = vector.extract_strided_slice %133 {offsets = [0, 0], sizes = [16, 72], strides = [1, 1]} : vector<18x72xbf16> to vector<16x72xbf16>
    %c0_101 = arith.constant 0 : index
    %c0_102 = arith.constant 0 : index
    %c0_103 = arith.constant 0 : index
    %135 = vector.load %arg2[%c0_101, %c0_102, %c0_103] : memref<3x72x64xbf16, #tpu.memory_space<vmem>>, vector<1x72x64xbf16>
    %136 = vector.shape_cast %135 : vector<1x72x64xbf16> to vector<72x64xbf16>
    %cst_104 = arith.constant dense<0.000000e+00> : vector<16x64xf32>
    %137 = tpu.matmul %134, %136, %cst_104 {dimension_numbers = #tpu.dot_dimension_numbers<[1], [0], [0], [1], [0, 0, 1, 1], [], []>} : vector<16x72xbf16>, vector<72x64xbf16>, vector<16x64xf32> -> vector<16x64xf32>
    %138 = vector.extract_strided_slice %133 {offsets = [1, 0], sizes = [16, 72], strides = [1, 1]} : vector<18x72xbf16> to vector<16x72xbf16>
    %c1_105 = arith.constant 1 : index
    %c0_106 = arith.constant 0 : index
    %c0_107 = arith.constant 0 : index
    %139 = vector.load %arg2[%c1_105, %c0_106, %c0_107] : memref<3x72x64xbf16, #tpu.memory_space<vmem>>, vector<1x72x64xbf16>
    %140 = vector.shape_cast %139 : vector<1x72x64xbf16> to vector<72x64xbf16>
    %cst_108 = arith.constant dense<0.000000e+00> : vector<16x64xf32>
    %141 = tpu.matmul %138, %140, %cst_108 {dimension_numbers = #tpu.dot_dimension_numbers<[1], [0], [0], [1], [0, 0, 1, 1], [], []>} : vector<16x72xbf16>, vector<72x64xbf16>, vector<16x64xf32> -> vector<16x64xf32>
    %142 = arith.addf %137, %141 : vector<16x64xf32>
    %143 = vector.extract_strided_slice %133 {offsets = [2, 0], sizes = [16, 72], strides = [1, 1]} : vector<18x72xbf16> to vector<16x72xbf16>
    %c2_109 = arith.constant 2 : index
    %c0_110 = arith.constant 0 : index
    %c0_111 = arith.constant 0 : index
    %144 = vector.load %arg2[%c2_109, %c0_110, %c0_111] : memref<3x72x64xbf16, #tpu.memory_space<vmem>>, vector<1x72x64xbf16>
    %145 = vector.shape_cast %144 : vector<1x72x64xbf16> to vector<72x64xbf16>
    %cst_112 = arith.constant dense<0.000000e+00> : vector<16x64xf32>
    %146 = tpu.matmul %143, %145, %cst_112 {dimension_numbers = #tpu.dot_dimension_numbers<[1], [0], [0], [1], [0, 0, 1, 1], [], []>} : vector<16x72xbf16>, vector<72x64xbf16>, vector<16x64xf32> -> vector<16x64xf32>
    %147 = arith.addf %142, %146 : vector<16x64xf32>
    %c1_113 = arith.constant 1 : index
    %c0_114 = arith.constant 0 : index
    %c0_115 = arith.constant 0 : index
    %148 = vector.load %arg11[%c1_113, %c0_114, %c0_115] : memref<2x16x64xf32, #tpu.memory_space<vmem>>, vector<1x16x64xf32>
    %149 = vector.shape_cast %148 : vector<1x16x64xf32> to vector<16x64xf32>
    %150 = vector.shape_cast %147 : vector<16x64xf32> to vector<1x16x64xf32>
    tpu.vector_store %arg11[%c1_113, %c0_114, %c0_115], %150 {strides = array<i32>} : memref<2x16x64xf32, #tpu.memory_space<vmem>>, vector<1x16x64xf32>,
    %c0_116 = arith.constant 0 : index
    %c0_117 = arith.constant 0 : index
    %c0_118 = arith.constant 0 : index
    %151 = vector.load %arg11[%c0_116, %c0_117, %c0_118] : memref<2x16x64xf32, #tpu.memory_space<vmem>>, vector<2x16x64xf32>
    %152 = vector.shape_cast %151 : vector<2x16x64xf32> to vector<32x64xf32>
    %cst_119 = arith.constant dense<0.000000e+00> : vector<64xf32>
    %153 = vector.multi_reduction <add>, %152, %cst_119 [0] : vector<32x64xf32> to vector<64xf32>
    %154 = vector.shape_cast %153 : vector<64xf32> to vector<1x64xf32>
    %155 = arith.mulf %152, %152 : vector<32x64xf32>
    %cst_120 = arith.constant dense<0.000000e+00> : vector<64xf32>
    %156 = vector.multi_reduction <add>, %155, %cst_120 [0] : vector<32x64xf32> to vector<64xf32>
    %157 = vector.shape_cast %156 : vector<64xf32> to vector<1x64xf32>
    %158 = tpu.concatenate %154, %157 in 0 : vector<1x64xf32>, vector<1x64xf32> -> vector<2x64xf32>
    %cst_121 = arith.constant dense<0.000000e+00> : vector<2x4xf32>
    %159 = tpu.matmul %158, %0, %cst_121 {dimension_numbers = #tpu.dot_dimension_numbers<[1], [0], [0], [1], [0, 0, 1, 1], [], []>} : vector<2x64xf32>, vector<64x4xf32>, vector<2x4xf32> -> vector<2x4xf32>
    %160 = vector.extract_strided_slice %159 {offsets = [0, 0], sizes = [1, 4], strides = [1, 1]} : vector<2x4xf32> to vector<1x4xf32>
    %cst_122 = arith.constant 0.001953125 : f32
    %161 = vector.broadcast %cst_122 : f32 to vector<1x4xf32>
    %162 = arith.mulf %160, %161 : vector<1x4xf32>
    %163 = vector.extract_strided_slice %159 {offsets = [1, 0], sizes = [1, 4], strides = [1, 1]} : vector<2x4xf32> to vector<1x4xf32>
    %cst_123 = arith.constant 0.001953125 : f32
    %164 = vector.broadcast %cst_123 : f32 to vector<1x4xf32>
    %165 = arith.mulf %163, %164 : vector<1x4xf32>
    %166 = arith.mulf %162, %162 : vector<1x4xf32>
    %167 = arith.subf %165, %166 : vector<1x4xf32>
    %cst_124 = arith.constant 0.000000e+00 : f32
    %168 = vector.broadcast %cst_124 : f32 to vector<1x4xf32>
    %169 = arith.maximumf %167, %168 : vector<1x4xf32>
    %c0_125 = arith.constant 0 : index
    %c0_126 = arith.constant 0 : index
    %170 = vector.load %arg5[%c0_125, %c0_126] : memref<1x4xf32, #tpu.memory_space<vmem>>, vector<1x4xf32>
    %cst_127 = arith.constant 9.99999974E-6 : f32
    %171 = vector.broadcast %cst_127 : f32 to vector<1x4xf32>
    %172 = arith.addf %169, %171 : vector<1x4xf32>
    %173 = math.rsqrt %172 : vector<1x4xf32>
    %174 = arith.mulf %170, %173 : vector<1x4xf32>
    %c0_128 = arith.constant 0 : index
    %c0_129 = arith.constant 0 : index
    %175 = vector.load %arg6[%c0_128, %c0_129] : memref<1x4xf32, #tpu.memory_space<vmem>>, vector<1x4xf32>
    %176 = arith.mulf %162, %174 : vector<1x4xf32>
    %177 = arith.subf %175, %176 : vector<1x4xf32>
    %178 = tpu.concatenate %174, %177 in 0 : vector<1x4xf32>, vector<1x4xf32> -> vector<2x4xf32>
    %cst_130 = arith.constant dense<0.000000e+00> : vector<2x64xf32>
    %179 = tpu.matmul %178, %1, %cst_130 {dimension_numbers = #tpu.dot_dimension_numbers<[1], [0], [0], [1], [0, 0, 1, 1], [], []>} : vector<2x4xf32>, vector<4x64xf32>, vector<2x64xf32> -> vector<2x64xf32>
    %c0_131 = arith.constant 0 : index
    %c0_132 = arith.constant 0 : index
    %c0_133 = arith.constant 0 : index
    %180 = vector.load %arg11[%c0_131, %c0_132, %c0_133] : memref<2x16x64xf32, #tpu.memory_space<vmem>>, vector<1x16x64xf32>
    %181 = vector.shape_cast %180 : vector<1x16x64xf32> to vector<16x64xf32>
    %182 = vector.extract_strided_slice %179 {offsets = [0, 0], sizes = [1, 64], strides = [1, 1]} : vector<2x64xf32> to vector<1x64xf32>
    %183 = vector.broadcast %182 : vector<1x64xf32> to vector<16x64xf32>
    %184 = arith.mulf %181, %183 : vector<16x64xf32>
    %185 = vector.extract_strided_slice %179 {offsets = [1, 0], sizes = [1, 64], strides = [1, 1]} : vector<2x64xf32> to vector<1x64xf32>
    %186 = vector.broadcast %185 : vector<1x64xf32> to vector<16x64xf32>
    %187 = arith.addf %184, %186 : vector<16x64xf32>
    %cst_134 = arith.constant 2.000000e-02 : f32
    %188 = vector.broadcast %cst_134 : f32 to vector<16x64xf32>
    %189 = arith.mulf %188, %187 : vector<16x64xf32>
    %190 = arith.maximumf %187, %189 : vector<16x64xf32>
    %c0_135 = arith.constant 0 : index
    %c0_136 = arith.constant 0 : index
    %c0_137 = arith.constant 0 : index
    %191 = vector.load %arg0[%c0_135, %c0_136, %c0_137] : memref<2x16x64xf32, #tpu.memory_space<vmem>>, vector<1x16x64xf32>
    %192 = vector.shape_cast %191 : vector<1x16x64xf32> to vector<16x64xf32>
    %193 = arith.addf %192, %190 : vector<16x64xf32>
    %c0_138 = arith.constant 0 : index
    %c0_139 = arith.constant 0 : index
    %c0_140 = arith.constant 0 : index
    %194 = vector.load %arg9[%c0_138, %c0_139, %c0_140] : memref<2x16x64xf32, #tpu.memory_space<vmem>>, vector<1x16x64xf32>
    %195 = vector.shape_cast %194 : vector<1x16x64xf32> to vector<16x64xf32>
    %196 = vector.shape_cast %193 : vector<16x64xf32> to vector<1x16x64xf32>
    tpu.vector_store %arg9[%c0_138, %c0_139, %c0_140], %196 {strides = array<i32>} : memref<2x16x64xf32, #tpu.memory_space<vmem>>, vector<1x16x64xf32>,
    %c1_141 = arith.constant 1 : index
    %c0_142 = arith.constant 0 : index
    %c0_143 = arith.constant 0 : index
    %197 = vector.load %arg11[%c1_141, %c0_142, %c0_143] : memref<2x16x64xf32, #tpu.memory_space<vmem>>, vector<1x16x64xf32>
    %198 = vector.shape_cast %197 : vector<1x16x64xf32> to vector<16x64xf32>
    %199 = vector.extract_strided_slice %179 {offsets = [0, 0], sizes = [1, 64], strides = [1, 1]} : vector<2x64xf32> to vector<1x64xf32>
    %200 = vector.broadcast %199 : vector<1x64xf32> to vector<16x64xf32>
    %201 = arith.mulf %198, %200 : vector<16x64xf32>
    %202 = vector.extract_strided_slice %179 {offsets = [1, 0], sizes = [1, 64], strides = [1, 1]} : vector<2x64xf32> to vector<1x64xf32>
    %203 = vector.broadcast %202 : vector<1x64xf32> to vector<16x64xf32>
    %204 = arith.addf %201, %203 : vector<16x64xf32>
    %cst_144 = arith.constant 2.000000e-02 : f32
    %205 = vector.broadcast %cst_144 : f32 to vector<16x64xf32>
    %206 = arith.mulf %205, %204 : vector<16x64xf32>
    %207 = arith.maximumf %204, %206 : vector<16x64xf32>
    %c1_145 = arith.constant 1 : index
    %c0_146 = arith.constant 0 : index
    %c0_147 = arith.constant 0 : index
    %208 = vector.load %arg0[%c1_145, %c0_146, %c0_147] : memref<2x16x64xf32, #tpu.memory_space<vmem>>, vector<1x16x64xf32>
    %209 = vector.shape_cast %208 : vector<1x16x64xf32> to vector<16x64xf32>
    %210 = arith.addf %209, %207 : vector<16x64xf32>
    %c1_148 = arith.constant 1 : index
    %c0_149 = arith.constant 0 : index
    %c0_150 = arith.constant 0 : index
    %211 = vector.load %arg9[%c1_148, %c0_149, %c0_150] : memref<2x16x64xf32, #tpu.memory_space<vmem>>, vector<1x16x64xf32>
    %212 = vector.shape_cast %211 : vector<1x16x64xf32> to vector<16x64xf32>
    %213 = vector.shape_cast %210 : vector<16x64xf32> to vector<1x16x64xf32>
    tpu.vector_store %arg9[%c1_148, %c0_149, %c0_150], %213 {strides = array<i32>} : memref<2x16x64xf32, #tpu.memory_space<vmem>>, vector<1x16x64xf32>,
    return
  }
}

</mosaic_0001>

<bundles_post_ra>
// kernel: residual_block.1
= control target key start
LH: loop header
LB: loop body
LE: loop exit
PB: predicated region body
PF: predicated region fallthrough
CT: control target
= control target key end

     0   :  { %vm54_vm0 = vsmask.f32 256  ;;  %vm42_vm1 = vcmask 584704   ;;  %v1657_v7 = vmov 0   ;;  %vm55_vm2 = vsmask.f32 4368  ;;  %s2172_s0 = inlined_call_operand.vmem [shape: f32[2,16,64], index: 0, kind: input, shape index: {}]   ;;  %s2173_s1 = inlined_call_operand.vmem [shape: bf16[3,72,64], index: 1, kind: input, shape index: {}]   ;;  %s2174_s7 = inlined_call_operand.vmem [shape: f32[64,4], index: 7, kind: input, shape index: {}]   ;;  %s2175_s8 = inlined_call_operand.vmem [shape: f32[4,64], index: 8, kind: input, shape index: {}]   ;;  %s2176_s3 = inlined_call_operand.vmem [shape: f32[1,4], index: 3, kind: input, shape index: {}]   ;;  %s2177_s4 = inlined_call_operand.vmem [shape: f32[1,4], index: 4, kind: input, shape index: {}]   ;;  %s2178_s2 = inlined_call_operand.vmem [shape: bf16[3,72,64], index: 2, kind: input, shape index: {}]   ;;  %s2179_s5 = inlined_call_operand.vmem [shape: f32[1,4], index: 5, kind: input, shape index: {}]   ;;  %s2180_s6 = inlined_call_operand.vmem [shape: f32[1,4], index: 6, kind: input, shape index: {}]   ;;  %s2181_s9 = inlined_call_operand.vmem [shape: f32[2,16,64], index: 9, kind: output, shape index: {}]  }
   0x1   :  { %v50_v0 = vld [vmem:[%s2172_s0] sm:$0xff]  ;;  %v51_v1 = vld [vmem:[%s2172_s0 + $0x8] sm:$0xff]  ;;  %v1368_v4 = vld [vmem:[%s2172_s0 + $0x10] sm:$0xff]  ;;  %43 = vst.msk [vmem:[#allocation2] sm:$0xf] %vm42_vm1, %v1657_v7  ;;  %vm170_vm4 = vcmask 1043456  }
   0x2   :  { %v52_v2 = vpack.c.bf16 %v50_v0, %v50_v0  ;;  %v53_v3 = vpack.c.bf16 %v51_v1, %v51_v1  ;;  %v1369_v5 = vld [vmem:[%s2172_s0 + $0x18] sm:$0xff]  ;;  %v107_v6 = vld [vmem:[%s2173_s1 + $0x20] sm:$0xf]  ;;  %v303_v8 = vpack.c.bf16 %v1368_v4, %v1368_v4  ;;  %44 = vst.msk [vmem:[#allocation2 + $0x4] sm:$0xf] %vm42_vm1, %v1657_v7  ;;  %vm1730_vm3 = vmor %vm54_vm0, %vm55_vm2  ;;  %s1658_s19 = smov 4  }
   0x3   :  { %v304_v9 = vpack.c.bf16 %v1369_v5, %v1369_v5  ;;  %v205_v10 = vunpack.c.l.b16 %v107_v6  ;;  %47 = vst.msk [vmem:[#allocation2 + $0xc] sm:$0xf] %vm42_vm1, %v1657_v7  ;;  %v1603_v33 = vld [vmem:[%s2173_s1 + $0x18] sm:$0xff]  ;;  %v1602_v37 = vld [vmem:[%s2173_s1 + $0x10] sm:$0xff]  ;;  %vm45_vm5 = vcmask 581632   ;;  %v1601_v39 = vld [vmem:[%s2173_s1 + $0x8] sm:$0xff] }
   0x4   :  { %v58_v11 = vshrl.u32 %v52_v2, 16  ;;  %v61_v12 = vshll.u32 %v52_v2, 16  ;;  %v66_v13 = vshrl.u32 %v53_v3, 16  ;;  %v69_v14 = vshll.u32 %v53_v3, 16  ;;  %48 = vst.msk [vmem:[#allocation2 + $0x10] sm:$0xf] %vm42_vm1, %v1657_v7 }
   0x5   :  { %v314_v15 = vshrl.u32 %v304_v9, 16  ;;  %v306_v18 = vshrl.u32 %v303_v8, 16  ;;  %v210_v19 = vpack.c.b16 %v205_v10, %v205_v10  ;;  %v317_v25 = vshll.u32 %v304_v9, 16  ;;  %v1350_v38 = vld [vmem:[%s2173_s1 + $0x68] sm:$0xf]  ;;  %v1600_v45 = vld [vmem:[%s2173_s1] sm:$0xff] }
   0x6   :  { %v60_v16 = vrot.slane %v58_v11, 7  ;;  %v68_v17 = vrot.slane %v66_v13, 7  ;;  %v309_v30 = vshll.u32 %v303_v8, 16  ;;  %49 = vst.msk [vmem:[#allocation2 + $0x14] sm:$0x1] %vm45_vm5, %v1657_v7  ;;  %v265_v40 = vunpack.c.l.b16 %v1350_v38  ;;  %v1611_v59 = vld [vmem:[%s2173_s1 + $0x60] sm:$0xff] }
   0x7   :  { %v316_v21 = vrot.slane %v314_v15, 7  ;;  %v308_v28 = vrot.slane %v306_v18, 7  ;;  %v218_v29 = vsel %vm170_vm4, %v210_v19, 0  ;;  %v1303_v41 = vld [vmem:[%s2173_s1 + $0x44] sm:$0xf]  ;;  %vm91_vm6 = vcmask 548896  }
   0x8   :  { %v63_v22 = vor.u32 %v61_v12, %v60_v16  ;;  %v64_v23 = vrot.slane %v60_v16, 4  ;;  %v71_v24 = vor.u32 %v69_v14, %v68_v17  ;;  %223 = vmatpush.bf16.msra.mxu1 %v218_v29  ;;  %v73_v34 = vrot.slane %v68_v17, 4  ;;  %46 = vst.msk [vmem:[#allocation2 + $0x8] sm:$0x1] %vm45_vm5, %v1657_v7  ;;  %v1378_v43 = vld [vmem:[%s2173_s1 + $0x44] sm:$0xf]  ;;  %vm1771_vm7 = vmand %vm91_vm6, %vm54_vm0 }
   0x9   :  { %v321_v26 = vrot.slane %v316_v21, 4  ;;  %v319_v31 = vor.u32 %v317_v25, %v316_v21  ;;  %v312_v32 = vrot.slane %v308_v28, 4  ;;  %v311_v35 = vor.u32 %v309_v30, %v308_v28  ;;  %v1425_v47 = vld [vmem:[%s2173_s1 + $0x68] sm:$0xf]  ;;  %v1607_v61 = vld [vmem:[%s2173_s1 + $0x3c] sm:$0xff]  ;;  %v1606_v1 = vld [vmem:[%s2173_s1 + $0x34] sm:$0xff] }
   0xa   :  { %74 = vrot.lane.b32.xlu0 %v63_v22, %s1658_s19  ;;  %v72_v27 = vsel %vm1730_vm3, %v64_v23, %v71_v24  ;;  %v156_v42 = vunpack.c.l.b16 %v1303_v41  ;;  %v270_v44 = vpack.c.b16 %v265_v40, %v265_v40  ;;  %v397_v46 = vunpack.c.l.b16 %v1378_v43  ;;  %v1620_v62 = vld [vmem:[%s2173_s1 + $0x3c] sm:$0xff]  ;;  %v1619_v2 = vld [vmem:[%s2173_s1 + $0x34] sm:$0xff]  ;;  %v1605_v6 = vld [vmem:[%s2173_s1 + $0x2c] sm:$0xff] }
   0xb   :  { %76 = vrot.lane.b32.xlu1 %v72_v27, %s1658_s19  ;;  %326 = vrot.lane.b32.xlu2 %v321_v26, %s1658_s19  ;;  %v320_v36 = vsel %vm1730_vm3, %v312_v32, %v319_v31  ;;  %v502_v49 = vunpack.c.l.b16 %v1425_v47  ;;  %v1624_v63 = vld [vmem:[%s2173_s1 + $0x60] sm:$0xff]  ;;  %v1610_v0 = vld [vmem:[%s2173_s1 + $0x58] sm:$0xff]  ;;  %vm83_vm8 = vcmask 551968   ;;  %vm84_vm9 = vsmask.f32 7938 }
   0xc   :  { %224 = vmatpush.bf16.msra.mxu1 %v1603_v33  ;;  %v161_v48 = vpack.c.b16 %v156_v42, %v156_v42  ;;  %v279_v50 = vsel %vm170_vm4, %v270_v44, 0  ;;  %v402_v51 = vpack.c.b16 %v397_v46, %v397_v46  ;;  %v1623_v3 = vld [vmem:[%s2173_s1 + $0x58] sm:$0xff]  ;;  %v1609_v4 = vld [vmem:[%s2173_s1 + $0x50] sm:$0xff]  ;;  %v350_v5 = vld [vmem:[%s2173_s1 + $0x20] sm:$0xf]  ;;  %vm166_vm11 = vcmask 588800  }
   0xd   :  { %284 = vmatpush.bf16.msra.mxu2 %v279_v50  ;;  %v507_v54 = vpack.c.b16 %v502_v49, %v502_v49  ;;  %v336_v56 = vld [vmem:[#allocation2 + $0x14] sm:$0x1]  ;;  %v444_v7 = vunpack.c.l.b16 %v350_v5  ;;  %v1618_v9 = vld [vmem:[%s2173_s1 + $0x2c] sm:$0xff]  ;;  %v1604_v13 = vld [vmem:[%s2173_s1 + $0x24] sm:$0xff]  ;;  %vm244_vm12 = vcmask 1046528   ;;  %vm297_vm14 = vcmask 523264  }
   0xe   :  { %v172_v53 = vsel %vm170_vm4, %v161_v48, 0  ;;  %v411_v55 = vsel %vm170_vm4, %v402_v51, 0  ;;  %v1622_v10 = vld [vmem:[%s2173_s1 + $0x50] sm:$0xff]  ;;  %v1608_v12 = vld [vmem:[%s2173_s1 + $0x48] sm:$0xff]  ;;  %v1616_v17 = vld [vmem:[%s2173_s1 + $0x18] sm:$0xff]  ;;  %vm571_vm15 = vcmask 1040384  }
   0xf   :  { %177 = vmatpush.bf16.msra.mxu0 %v172_v53  ;;  %416 = vmatpush.bf16.msra.mxu3 %v411_v55  ;;  %v516_v58 = vsel %vm170_vm4, %v507_v54, 0  ;;  %v449_v11 = vpack.c.b16 %v444_v7, %v444_v7  ;;  %v1617_v15 = vld [vmem:[%s2173_s1 + $0x24] sm:$0xff]  ;;  %v1615_v18 = vld [vmem:[%s2173_s1 + $0x10] sm:$0xff]  ;;  %vm1840_vm10 = vmand %vm83_vm8, %vm84_vm9  ;;  %vm126_vm13 = vsmask.f32 7424  ;;  %vm628_vm5 = vcmask 31744  }
  0x10   :  { %225 = vmatpush.bf16.msra.mxu1 %v1602_v37  ;;  %v1621_v16 = vld [vmem:[%s2173_s1 + $0x48] sm:$0xff]  ;;  %v1613_v26 = vld [vmem:[%s2173_s1] sm:$0xff]  ;;  %v93_v27 = vld [vmem:[#allocation2 + $0x8] sm:$0x1] }
  0x11   :  { %285 = vmatpush.bf16.msra.mxu2 %v1611_v59  ;;  %v457_v14 = vsel %vm170_vm4, %v449_v11, 0  ;;  %v86_v21 = vld [vmem:[#allocation2] sm:$0xf]  ;;  %v332_v29 = vld [vmem:[#allocation2 + $0xc] sm:$0xf]  ;;  %v1893_v5 = vld [vmem:[%s2174_s7 + $0x18] sm:$0xff] }
  0x12   :  { %78 = vrot.lane.b32.xlu0 %v73_v34, %s1658_s19  ;;  %v1614_v25 = vld [vmem:[%s2173_s1 + $0x8] sm:$0xff] }
  0x13   :  { %322 = vrot.lane.b32.xlu1 %v311_v35, %s1658_s19  ;;  %324 = vrot.lane.b32.xlu2 %v320_v36, %s1658_s19 }
  0x14   :  { %226 = vmatpush.bf16.msra.mxu1 %v1601_v39  ;;  %178 = vmatpush.bf16.msra.mxu0 %v1607_v61 }
  0x15   :  { %417 = vmatpush.bf16.msra.mxu3 %v1620_v62  ;;  %286 = vmatpush.bf16.msra.mxu2 %v1610_v0  ;;  %v1875_v0 = vld [vmem:[%s2174_s7 + $0x30] sm:$0xff] }
  0x18   :  { %227 = vmatpush.bf16.msra.mxu1 %v1600_v45  ;;  %179 = vmatpush.bf16.msra.mxu0 %v1606_v1  ;;  %v1881_v1 = vld [vmem:[%s2174_s7 + $0x28] sm:$0xff] }
  0x19   :  { %418 = vmatpush.bf16.msra.mxu3 %v1619_v2  ;;  %287 = vmatpush.bf16.msra.mxu2 %v1609_v4 }
  0x1c   :  { %521 = vmatpush.bf16.msrb.mxu1 %v516_v58  ;;  %180 = vmatpush.bf16.msra.mxu0 %v1605_v6 }
  0x1d   :  { %419 = vmatpush.bf16.msra.mxu3 %v1618_v9  ;;  %288 = vmatpush.bf16.msra.mxu2 %v1608_v12  ;;  %v1912_v12 = vld [vmem:[%s2174_s7] sm:$0xff] }
  0x20   :  { %522 = vmatpush.bf16.msrb.mxu1 %v1624_v63  ;;  %181 = vmatpush.bf16.msra.mxu0 %v1604_v13  ;;  %v1870_v63 = vld [vmem:[%s2174_s7 + $0x38] sm:$0xff] }
  0x21   :  { %420 = vmatpush.bf16.msra.mxu3 %v1617_v15  ;;  %584 = vmatpush.msrb.mxu2 %v1870_v63 }
  0x23   :  { %585 = vmatpush.msrb.mxu2 %v1875_v0 }
  0x24   :  { %523 = vmatpush.bf16.msrb.mxu1 %v1623_v3  ;;  %462 = vmatpush.bf16.msrb.mxu0 %v457_v14  ;;  %v1887_v3 = vld [vmem:[%s2174_s7 + $0x20] sm:$0xff] }
  0x25   :  { %586 = vmatpush.msrb.mxu2 %v1881_v1 }
  0x27   :  { %587 = vmatpush.msrb.mxu2 %v1887_v3 }
  0x28   :  { %524 = vmatpush.bf16.msrb.mxu1 %v1622_v10  ;;  %463 = vmatpush.bf16.msrb.mxu0 %v1616_v17  ;;  %v1906_v10 = vld [vmem:[%s2174_s7 + $0x8] sm:$0xff] }
  0x29   :  { %588 = vmatpush.msrb.mxu2 %v1893_v5 }
  0x2c   :  { %525 = vmatpush.bf16.msrb.mxu1 %v1621_v16  ;;  %464 = vmatpush.bf16.msrb.mxu0 %v1615_v18 }
  0x30   :  { %465 = vmatpush.bf16.msrb.mxu0 %v1614_v25 }
  0x34   :  { %466 = vmatpush.bf16.msrb.mxu0 %v1613_v26 }
  0x65   :  { %v327_v57 = vpop.permute.xlu2 %326 }
  0x66   :  { %v337_v60 = vsel %vm1771_vm7, %v327_v57, %v336_v56 }
  0x67   :  { %338 = vst [vmem:[#allocation2 + $0x14] sm:$0x1] %v337_v60 }
  0x6d   :  { %v325_v8 = vpop.permute.xlu2 %324 }
  0x6e   :  { %335 = vst.msk [vmem:[#allocation2 + $0x10] sm:$0xf] %vm83_vm8, %v325_v8  ;;  %v341_v28 = vld [vmem:[#allocation2 + $0x14] sm:$0x1]  ;;  %v1899_v8 = vld [vmem:[%s2174_s7 + $0x10] sm:$0xff] }
  0x6f   :  { %v365_v33 = vunpack.c.l.b16 %v341_v28  ;;  %589 = vmatpush.msrb.mxu2 %v1899_v8 }
  0x71   :  { %v367_v36 = vpack.c.b16 %v365_v33, %v365_v33  ;;  %590 = vmatpush.msrb.mxu2 %v1906_v10 }
  0x73   :  { %v376_v39 = vshll.u32 %v367_v36, 16  ;;  %v483_v49 = vrot.slane %v367_v36, 1  ;;  %591 = vmatpush.msrb.mxu2 %v1912_v12 }
  0x75   :  { %v378_v47 = vrot.slane %v376_v39, 1 }
  0x7c   :  { %v75_v22 = vpop.permute.xlu0 %74 }
  0x7d   :  { %v87_v23 = vsel %vm1840_vm10, %v75_v22, %v86_v21  ;;  %v77_v24 = vpop.permute.xlu1 %76 }
  0x7e   :  { %88 = vst [vmem:[#allocation2] sm:$0xf] %v87_v23 }
  0x7f   :  { %90 = vst.msk [vmem:[#allocation2 + $0x4] sm:$0xf] %vm83_vm8, %v77_v24 }
  0x84   :  { %v79_v30 = vpop.permute.xlu0 %78 }
  0x85   :  { %v94_v31 = vsel %vm1771_vm7, %v79_v30, %v93_v27  ;;  %v323_v32 = vpop.permute.xlu1 %322 }
  0x86   :  { %95 = vst [vmem:[#allocation2 + $0x8] sm:$0x1] %v94_v31  ;;  %v333_v34 = vsel %vm1840_vm10, %v323_v32, %v332_v29  ;;  %v1599_v35 = vld [vmem:[#allocation2] sm:$0xff] }
  0x87   :  { %334 = vst [vmem:[#allocation2 + $0xc] sm:$0xf] %v333_v34  ;;  %1341 = vmatmul.msk.bf16.vlgmr.msra.gmra.mxu1 %vm166_vm11, %v1599_v35  ;;  %v130_v37 = vshll.u32 %v1599_v35, 16  ;;  %v245_v46 = vrot.slane %v1599_v35, 1  ;;  %v128_v51 = vshrl.u32 %v1599_v35, 16 }
  0x89   :  { %v132_v43 = vrot.slane %v130_v37, 1 }
  0x8b   :  { %v133_v56 = vor.u32 %v132_v43, %v128_v51 }
  0x8d   :  { %v98_v38 = vld [vmem:[#allocation2 + $0x8] sm:$0x1] }
  0x8e   :  { %v123_v40 = vunpack.c.l.b16 %v98_v38  ;;  %v1612_v41 = vld [vmem:[#allocation2 + $0xc] sm:$0xff] }
  0x8f   :  { %v369_v44 = vshrl.u32 %v1612_v41, 16  ;;  %v371_v45 = vshll.u32 %v1612_v41, 16  ;;  %v482_v48 = vrot.slane %v1612_v41, 1 }
  0x90   :  { %v125_v42 = vpack.c.b16 %v123_v40, %v123_v40 }
  0x91   :  { %v373_v54 = vrot.slane %v371_v45, 1  ;;  %v484_v59 = vsel %vm244_vm12, %v482_v48, %v483_v49 }
  0x92   :  { %v246_v50 = vrot.slane %v125_v42, 1  ;;  %v135_v53 = vshll.u32 %v125_v42, 16 }
  0x93   :  { %v374_v58 = vor.u32 %v373_v54, %v369_v44 }
  0x94   :  { %v247_v55 = vsel %vm244_vm12, %v245_v46, %v246_v50  ;;  %v137_v57 = vrot.slane %v135_v53, 1 }
  0x95   :  { %1367 = vmatmul.msk.bf16.vlgmr.msra.gmra.mxu2 %vm166_vm11, %v247_v55  ;;  %v379_v61 = vsel %vm126_vm13, %v374_v58, %v378_v47 }
  0x96   :  { %v138_v60 = vsel %vm126_vm13, %v133_v56, %v137_v57  ;;  %1399 = vmatmul.msk.bf16.vlgmr.msra.gmra.mxu3 %vm166_vm11, %v379_v61 }
  0x97   :  { %1324 = vmatmul.msk.bf16.vlgmr.msra.gmra.mxu0 %vm166_vm11, %v138_v60  ;;  %1442 = vmatmul.msk.bf16.vlgmr.msrb.gmra.mxu1 %vm166_vm11, %v484_v59 }
  0xa7   :  { %1416 = vmatmul.msk.bf16.vlgmr.msrb.gmra.mxu0 %vm166_vm11, %v1612_v41 }
 0x104   :  { %v229_v62 = vpop.f32.mrf.mxu1 }
 0x10c   :  { %v231_v9 = vpop.f32.mrf.mxu1 }
 0x114   :  { %v183_v2 = vpop.f32.mrf.mxu0  ;;  %v527_v17 = vpop.f32.mrf.mxu1 }
 0x115   :  { %v230_v4 = vadd.f32 %v229_v62, %v183_v2 }
 0x118   :  { %v290_v6 = vpop.f32.mrf.mxu2 }
 0x119   :  { %v295_v7 = vadd.f32 %v290_v6, %v230_v4  ;;  %v422_v16 = vpop.f32.mrf.mxu3 }
 0x11b   :  { %298 = vst.msk [vmem:[#allocation3] sm:$0xff] %vm297_vm14, %v295_v7 }
 0x11c   :  { %v185_v11 = vpop.f32.mrf.mxu0  ;;  %v529_v26 = vpop.f32.mrf.mxu1 }
 0x11d   :  { %v232_v13 = vadd.f32 %v231_v9, %v185_v11 }
 0x120   :  { %v292_v14 = vpop.f32.mrf.mxu2 }
 0x121   :  { %v296_v15 = vadd.f32 %v292_v14, %v232_v13  ;;  %v424_v23 = vpop.f32.mrf.mxu3 }
 0x122   :  { %v1920_v29 = vld [vmem:[#allocation3] sm:$0xff] }
 0x123   :  { %299 = vst.msk [vmem:[#allocation3 + $0x8] sm:$0xff] %vm297_vm14, %v296_v15  ;;  %v554_v33 = vmul.f32 %v1920_v29, %v1920_v29  ;;  %v541_v35 = vsel %vm297_vm14, %v1920_v29, 0.0  ;;  %v1952_v15 = vld [vmem:[%s2175_s8] sm:$0xf] }
 0x124   :  { %v468_v18 = vpop.f32.mrf.mxu0  ;;  %1444 = vmatpush.msk.msrb.mxu3 %vm170_vm4, %v1952_v15 }
 0x125   :  { %v469_v21 = vadd.f32 %v468_v18, %v422_v16  ;;  %v558_v39 = vsel %vm297_vm14, %v554_v33, 0.0 }
 0x127   :  { %v532_v22 = vadd.f32 %v527_v17, %v469_v21 }
 0x129   :  { %535 = vst.msk [vmem:[#allocation3 + $0x10] sm:$0xff] %vm297_vm14, %v532_v22 }
 0x12a   :  { %v1918_v27 = vld [vmem:[#allocation3 + $0x8] sm:$0xff] }
 0x12b   :  { %v555_v31 = vmul.f32 %v1918_v27, %v1918_v27  ;;  %v542_v32 = vsel %vm297_vm14, %v1918_v27, 0.0 }
 0x12c   :  { %v470_v24 = vpop.f32.mrf.mxu0  ;;  %v543_v38 = vadd.f32 %v542_v32, %v541_v35 }
 0x12d   :  { %v471_v25 = vadd.f32 %v470_v24, %v424_v23  ;;  %v559_v37 = vsel %vm297_vm14, %v555_v31, 0.0  ;;  %v621_v31 = vld [vmem:[%s2177_s4] sm:$0x1] }
 0x12e   :  { %v560_v43 = vadd.f32 %v559_v37, %v558_v39 }
 0x12f   :  { %v533_v28 = vadd.f32 %v529_v26, %v471_v25  ;;  %v603_v25 = vld [vmem:[%s2176_s3] sm:$0x1] }
 0x130   :  { %v1922_v30 = vld [vmem:[#allocation3 + $0x10] sm:$0xff] }
 0x131   :  { %536 = vst.msk [vmem:[#allocation3 + $0x18] sm:$0xff] %vm297_vm14, %v533_v28  ;;  %v556_v34 = vmul.f32 %v1922_v30, %v1922_v30  ;;  %v544_v36 = vsel %vm297_vm14, %v1922_v30, 0.0 }
 0x132   :  { %v545_v42 = vadd.f32 %v544_v36, %v543_v38 }
 0x133   :  { %v561_v40 = vsel %vm297_vm14, %v556_v34, 0.0 }
 0x134   :  { %v562_v47 = vadd.f32 %v561_v40, %v560_v43 }
 0x138   :  { %v1940_v41 = vld [vmem:[#allocation3 + $0x18] sm:$0xff] }
 0x139   :  { %v546_v44 = vsel %vm297_vm14, %v1940_v41, 0.0  ;;  %v557_v45 = vmul.f32 %v1940_v41, %v1940_v41 }
 0x13a   :  { %v547_v46 = vadd.f32 %v546_v44, %v545_v42 }
 0x13b   :  { %v563_v48 = vsel %vm297_vm14, %v557_v45, 0.0 }
 0x13c   :  { %v548_v49 = vrot.slane %v547_v46, 4  ;;  %v564_v50 = vadd.f32 %v563_v48, %v562_v47 }
 0x13e   :  { %v549_v51 = vadd.f32 %v548_v49, %v547_v46  ;;  %v565_v53 = vrot.slane %v564_v50, 4 }
 0x140   :  { %v550_v54 = vrot.slane %v549_v51, 2  ;;  %v566_v55 = vadd.f32 %v565_v53, %v564_v50 }
 0x142   :  { %v551_v56 = vadd.f32 %v550_v54, %v549_v51  ;;  %v567_v57 = vrot.slane %v566_v55, 2 }
 0x144   :  { %v552_v58 = vrot.slane %v551_v56, 1  ;;  %v568_v59 = vadd.f32 %v567_v57, %v566_v55 }
 0x146   :  { %v569_v60 = vrot.slane %v568_v59, 1  ;;  %v553_v61 = vadd.f32 %v552_v58, %v551_v56 }
 0x148   :  { %v570_v62 = vadd.f32 %v569_v60, %v568_v59 }
 0x14a   :  { %v572_v2 = vsel %vm571_vm15, %v553_v61, %v570_v62 }
 0x14b   :  { %1443 = vmatmul.msk.f32.vlgmr.msrb.gmra.mxu2 %vm297_vm14, %v572_v2 }
 0x1ce   :  { %v593_v4 = vpop.f32.mrf.mxu2 }
 0x1cf   :  { %v596_v6 = vmul.f32 0.001953125, %v593_v4 }
 0x1d1   :  { %v597_v7 = vmul.f32 %v596_v6, %v596_v6 }
 0x1d3   :  { %v599_v9 = vrot.slane %v597_v7, 7 }
 0x1d5   :  { %v601_v11 = vsub.f32 %v596_v6, %v599_v9 }
 0x1d7   :  { %v602_v13 = vmax.f32 %v601_v11, 0.0 }
 0x1d9   :  { %v604_v14 = vadd.f32 1e-05, %v602_v13 }
 0x1db   :  { %1653 = vrsqrt.f32 %v604_v14  ;;  %vm611_vm1 = vweird.f32 %v604_v14 }
 0x1e1   :  { %v1654_v16 = vpop.eup %1653 }
 0x1e2   :  { %v606_v17 = vmul.f32 %v1654_v16, %v604_v14  ;;  %vm612_vm0 = vweird.f32 %v1654_v16 }
 0x1e3   :  { %vm613_vm2 = vmor %vm611_vm1, %vm612_vm0 }
 0x1e4   :  { %v607_v18 = vmul.f32 %v1654_v16, %v606_v17 }
 0x1e6   :  { %v608_v21 = vmul.f32 0.5, %v607_v18 }
 0x1e8   :  { %v609_v22 = vsub.f32 1.5, %v608_v21 }
 0x1ea   :  { %v610_v23 = vmul.f32 %v1654_v16, %v609_v22 }
 0x1ec   :  { %v614_v24 = vsel %vm613_vm2, %v1654_v16, %v610_v23 }
 0x1ed   :  { %616 = vst [vmem:[#allocation1] sm:$0xff] %v614_v24 }
 0x1f4   :  { %v618_v26 = vld [vmem:[#allocation1 + $0x1] ss:$9 sm:$0xff] }
 0x1f5   :  { %v620_v28 = vmul.f32 %v618_v26, %v603_v25  ;;  %v713_v26 = vld [vmem:[%s2178_s2 + $0x20] sm:$0xf] }
 0x1f7   :  { %v622_v32 = vmul.f32 %v620_v28, %v596_v6 }
 0x1f9   :  { %v623_v33 = vsub.f32 %v621_v31, %v622_v32  ;;  %v808_v31 = vunpack.c.l.b16 %v713_v26 }
 0x1fb   :  { %v625_v34 = vperm.slane %v623_v33, 0  ;;  %v1454_v33 = vld [vmem:[%s2178_s2 + $0x44] sm:$0xf] }
 0x1fd   :  { %v627_v35 = vsel %vm571_vm15, %v620_v28, %v625_v34  ;;  %v1501_v28 = vld [vmem:[%s2178_s2 + $0x68] sm:$0xf]  ;;  %v761_v34 = vunpack.c.l.b16 %v1454_v33 }
 0x1fe   :  { %1445 = vmatmul.msk.f32.vlgmr.msrb.gmra.mxu3 %vm628_vm5, %v627_v35  ;;  %v867_v32 = vunpack.c.l.b16 %v1501_v28  ;;  %v813_v35 = vpack.c.b16 %v808_v31, %v808_v31 }
 0x200   :  { %v872_v20 = vpack.c.b16 %v867_v32, %v867_v32 }
 0x281   :  { %v652_v36 = vpop.f32.mrf.mxu3 }
 0x282   :  { %v657_v37 = vperm.slane %v652_v36, 0  ;;  %v660_v38 = vperm.slane %v652_v36, 1  ;;  %v766_v36 = vpack.c.b16 %v761_v34, %v761_v34 }
 0x284   :  { %v658_v39 = vmul.f32 %v657_v37, %v1920_v29  ;;  %v659_v40 = vmul.f32 %v657_v37, %v1918_v27  ;;  %v903_v42 = vmul.f32 %v657_v37, %v1922_v30  ;;  %v904_v43 = vmul.f32 %v657_v37, %v1940_v41 }
 0x285   :  { %v821_v37 = vsel %vm170_vm4, %v813_v35, 0 }
 0x286   :  { %v661_v44 = vadd.f32 %v660_v38, %v658_v39  ;;  %v662_v45 = vadd.f32 %v660_v38, %v659_v40  ;;  %v905_v46 = vadd.f32 %v903_v42, %v660_v38  ;;  %v906_v47 = vadd.f32 %v904_v43, %v660_v38  ;;  %826 = vmatpush.bf16.msra.mxu3 %v821_v37  ;;  %v1629_v39 = vld [vmem:[%s2178_s2 + $0x18] sm:$0xff]  ;;  %v1628_v42 = vld [vmem:[%s2178_s2 + $0x10] sm:$0xff]  ;;  %v1637_v43 = vld [vmem:[%s2178_s2 + $0x60] sm:$0xff] }
 0x287   :  { %v881_v38 = vsel %vm170_vm4, %v872_v20, 0  ;;  %v775_v40 = vsel %vm170_vm4, %v766_v36, 0 }
 0x288   :  { %v664_v48 = vmul.f32 0.02, %v662_v45  ;;  %v663_v49 = vmul.f32 0.02, %v661_v44  ;;  %v907_v50 = vmul.f32 0.02, %v905_v46  ;;  %886 = vmatpush.bf16.msra.mxu0 %v881_v38  ;;  %780 = vmatpush.bf16.msra.mxu2 %v775_v40 }
 0x289   :  { %v908_v51 = vmul.f32 0.02, %v906_v47 }
 0x28a   :  { %v666_v53 = vmax.f32 %v662_v45, %v664_v48  ;;  %v665_v54 = vmax.f32 %v661_v44, %v663_v49  ;;  %v909_v55 = vmax.f32 %v905_v46, %v907_v50  ;;  %827 = vmatpush.bf16.msra.mxu3 %v1629_v39  ;;  %v1633_v44 = vld [vmem:[%s2178_s2 + $0x3c] sm:$0xff]  ;;  %v1627_v45 = vld [vmem:[%s2178_s2 + $0x8] sm:$0xff]  ;;  %v1527_v49 = vld [vmem:[%s2178_s2 + $0x44] sm:$0xf] }
 0x28b   :  { %v910_v56 = vmax.f32 %v906_v47, %v908_v51  ;;  %v1636_v46 = vld [vmem:[%s2178_s2 + $0x58] sm:$0xff]  ;;  %v1626_v48 = vld [vmem:[%s2178_s2] sm:$0xff]  ;;  %v1574_v50 = vld [vmem:[%s2178_s2 + $0x68] sm:$0xf]  ;;  %v1004_v51 = vunpack.c.l.b16 %v1527_v49 }
 0x28c   :  { %v668_v57 = vpack.c.bf16 %v666_v53, %v666_v53  ;;  %v667_v29 = vpack.c.bf16 %v665_v54, %v665_v54  ;;  %v911_v58 = vpack.c.bf16 %v909_v55, %v909_v55  ;;  %887 = vmatpush.bf16.msra.mxu0 %v1637_v43  ;;  %v1632_v47 = vld [vmem:[%s2178_s2 + $0x34] sm:$0xff]  ;;  %781 = vmatpush.bf16.msra.mxu2 %v1633_v44  ;;  %v1109_v53 = vunpack.c.l.b16 %v1574_v50 }
 0x28d   :  { %v912_v27 = vpack.c.bf16 %v910_v56, %v910_v56  ;;  %v1009_v54 = vpack.c.b16 %v1004_v51, %v1004_v51 }
 0x28e   :  { %v678_v59 = vshrl.u32 %v668_v57, 16  ;;  %v670_v30 = vshrl.u32 %v667_v29, 16  ;;  %v673_v60 = vshll.u32 %v667_v29, 16  ;;  %v681_v41 = vshll.u32 %v668_v57, 16  ;;  %828 = vmatpush.bf16.msra.mxu3 %v1628_v42 }
 0x28f   :  { %v914_v2 = vshrl.u32 %v911_v58, 16  ;;  %v922_v4 = vshrl.u32 %v912_v27, 16  ;;  %v925_v17 = vshll.u32 %v912_v27, 16  ;;  %v917_v18 = vshll.u32 %v911_v58, 16  ;;  %v1635_v58 = vld [vmem:[%s2178_s2 + $0x50] sm:$0xff] }
 0x290   :  { %v680_v61 = vrot.slane %v678_v59, 7  ;;  %v672_v62 = vrot.slane %v670_v30, 7  ;;  %888 = vmatpush.bf16.msra.mxu0 %v1636_v46  ;;  %v1114_v55 = vpack.c.b16 %v1109_v53, %v1109_v53  ;;  %782 = vmatpush.bf16.msra.mxu2 %v1632_v47  ;;  %v1018_v57 = vsel %vm170_vm4, %v1009_v54, 0  ;;  %v1631_v27 = vld [vmem:[%s2178_s2 + $0x2c] sm:$0xff]  ;;  %v1646_v59 = vld [vmem:[%s2178_s2 + $0x3c] sm:$0xff] }
 0x291   :  { %v916_v14 = vrot.slane %v914_v2, 7  ;;  %v924_v16 = vrot.slane %v922_v4, 7  ;;  %1023 = vmatpush.bf16.msra.mxu1 %v1018_v57  ;;  %v1650_v30 = vld [vmem:[%s2178_s2 + $0x60] sm:$0xff]  ;;  %v1645_v2 = vld [vmem:[%s2178_s2 + $0x34] sm:$0xff] }
 0x292   :  { %v685_v6 = vrot.slane %v680_v61, 4  ;;  %v675_v7 = vor.u32 %v673_v60, %v672_v62  ;;  %v676_v9 = vrot.slane %v672_v62, 4  ;;  %v683_v11 = vor.u32 %v681_v41, %v680_v61  ;;  %829 = vmatpush.bf16.msra.mxu3 %v1627_v45  ;;  %v957_v60 = vld [vmem:[%s2178_s2 + $0x20] sm:$0xf]  ;;  %v1634_v41 = vld [vmem:[%s2178_s2 + $0x48] sm:$0xff] }
 0x293   :  { %v920_v21 = vrot.slane %v916_v14, 4  ;;  %v927_v22 = vor.u32 %v925_v17, %v924_v16  ;;  %v919_v23 = vor.u32 %v917_v18, %v916_v14  ;;  %v929_v24 = vrot.slane %v924_v16, 4  ;;  %v1630_v61 = vld [vmem:[%s2178_s2 + $0x24] sm:$0xff]  ;;  %v1648_v14 = vld [vmem:[%s2178_s2 + $0x50] sm:$0xff] }
 0x294   :  { %690 = vrot.lane.b32.xlu1 %v685_v6, %s1658_s19  ;;  %686 = vrot.lane.b32.xlu0 %v675_v7, %s1658_s19  ;;  %v684_v13 = vsel %vm1730_vm3, %v676_v9, %v683_v11  ;;  %v1123_v29 = vsel %vm170_vm4, %v1114_v55, 0  ;;  %v1051_v62 = vunpack.c.l.b16 %v957_v60  ;;  %v1649_v6 = vld [vmem:[%s2178_s2 + $0x58] sm:$0xff]  ;;  %v1644_v11 = vld [vmem:[%s2178_s2 + $0x2c] sm:$0xff]  ;;  %v695_v18 = vld [vmem:[#allocation2] sm:$0xf] }
 0x295   :  { %688 = vrot.lane.b32.xlu2 %v684_v13, %s1658_s19  ;;  %v928_v25 = vsel %vm1730_vm3, %v920_v21, %v927_v22  ;;  %889 = vmatpush.bf16.msra.mxu0 %v1635_v58  ;;  %v1642_v13 = vld [vmem:[%s2178_s2 + $0x18] sm:$0xff]  ;;  %v1643_v16 = vld [vmem:[%s2178_s2 + $0x24] sm:$0xff] }
 0x296   :  { %830 = vmatpush.bf16.msra.mxu3 %v1626_v48  ;;  %783 = vmatpush.bf16.msra.mxu2 %v1631_v27  ;;  %v1056_v4 = vpack.c.b16 %v1051_v62, %v1051_v62  ;;  %v1647_v17 = vld [vmem:[%s2178_s2 + $0x48] sm:$0xff] }
 0x297   :  { %1024 = vmatpush.bf16.msra.mxu1 %v1646_v59 }
 0x298   :  { %v1064_v7 = vsel %vm170_vm4, %v1056_v4, 0 }
 0x299   :  { %890 = vmatpush.bf16.msra.mxu0 %v1634_v41 }
 0x29a   :  { %1128 = vmatpush.bf16.msrb.mxu3 %v1123_v29  ;;  %784 = vmatpush.bf16.msra.mxu2 %v1630_v61 }
 0x29b   :  { %1025 = vmatpush.bf16.msra.mxu1 %v1645_v2 }
 0x29c   :  { %930 = vrot.lane.b32.xlu1 %v919_v23, %s1658_s19  ;;  %934 = vrot.lane.b32.xlu0 %v929_v24, %s1658_s19  ;;  %v943_v24 = vld [vmem:[#allocation2 + $0x14] sm:$0x1] }
 0x29d   :  { %932 = vrot.lane.b32.xlu2 %v928_v25, %s1658_s19  ;;  %1189 = vmatpush.msrb.mxu0 %v1870_v63  ;;  %v1641_v63 = vld [vmem:[%s2178_s2 + $0x10] sm:$0xff] }
 0x29e   :  { %1129 = vmatpush.bf16.msrb.mxu3 %v1650_v30  ;;  %1069 = vmatpush.bf16.msrb.mxu2 %v1064_v7 }
 0x29f   :  { %1190 = vmatpush.msrb.mxu0 %v1875_v0  ;;  %1026 = vmatpush.bf16.msra.mxu1 %v1644_v11  ;;  %v1640_v0 = vld [vmem:[%s2178_s2 + $0x8] sm:$0xff] }
 0x2a1   :  { %1191 = vmatpush.msrb.mxu0 %v1881_v1  ;;  %v1639_v1 = vld [vmem:[%s2178_s2] sm:$0xff] }
 0x2a2   :  { %1130 = vmatpush.bf16.msrb.mxu3 %v1649_v6  ;;  %1070 = vmatpush.bf16.msrb.mxu2 %v1642_v13 }
 0x2a3   :  { %1192 = vmatpush.msrb.mxu0 %v1887_v3  ;;  %1027 = vmatpush.bf16.msra.mxu1 %v1643_v16  ;;  %v699_v3 = vld [vmem:[#allocation2 + $0x8] sm:$0x1] }
 0x2a5   :  { %1193 = vmatpush.msrb.mxu0 %v1893_v5 }
 0x2a6   :  { %1131 = vmatpush.bf16.msrb.mxu3 %v1648_v14  ;;  %1071 = vmatpush.bf16.msrb.mxu2 %v1641_v63 }
 0x2a7   :  { %1194 = vmatpush.msrb.mxu0 %v1899_v8  ;;  %1593 = vmatpush.msk.msrb.mxu1 %vm170_vm4, %v1952_v15  ;;  %v939_v15 = vld [vmem:[#allocation2 + $0xc] sm:$0xf] }
 0x2a9   :  { %1195 = vmatpush.msrb.mxu0 %v1906_v10 }
 0x2aa   :  { %1132 = vmatpush.bf16.msrb.mxu3 %v1647_v17  ;;  %1072 = vmatpush.bf16.msrb.mxu2 %v1640_v0 }
 0x2ab   :  { %1196 = vmatpush.msrb.mxu0 %v1912_v12 }
 0x2ae   :  { %1073 = vmatpush.bf16.msrb.mxu2 %v1639_v1 }
 0x2ef   :  { %v689_v56 = vpop.permute.xlu2 %688 }
 0x2f0   :  { %698 = vst.msk [vmem:[#allocation2 + $0x4] sm:$0xf] %vm83_vm8, %v689_v56 }
 0x2f7   :  { %v933_v9 = vpop.permute.xlu2 %932 }
 0x2f8   :  { %942 = vst.msk [vmem:[#allocation2 + $0x10] sm:$0xf] %vm83_vm8, %v933_v9 }
 0x306   :  { %v691_v5 = vpop.permute.xlu1 %690  ;;  %v687_v21 = vpop.permute.xlu0 %686 }
 0x307   :  { %v700_v22 = vsel %vm1771_vm7, %v691_v5, %v699_v3  ;;  %v696_v8 = vsel %vm1840_vm10, %v687_v21, %v695_v18 }
 0x308   :  { %701 = vst [vmem:[#allocation2 + $0x8] sm:$0x1] %v700_v22 }
 0x309   :  { %697 = vst [vmem:[#allocation2] sm:$0xf] %v696_v8 }
 0x30e   :  { %v931_v23 = vpop.permute.xlu1 %930  ;;  %v935_v25 = vpop.permute.xlu0 %934 }
 0x30f   :  { %v940_v10 = vsel %vm1840_vm10, %v931_v23, %v939_v15  ;;  %v944_v12 = vsel %vm1771_vm7, %v935_v25, %v943_v24  ;;  %v704_v26 = vld [vmem:[#allocation2 + $0x8] sm:$0x1] }
 0x310   :  { %941 = vst [vmem:[#allocation2 + $0xc] sm:$0xf] %v940_v10  ;;  %v1625_v28 = vld [vmem:[#allocation2] sm:$0xff]  ;;  %v729_v31 = vunpack.c.l.b16 %v704_v26 }
 0x311   :  { %945 = vst [vmem:[#allocation2 + $0x14] sm:$0x1] %v944_v12  ;;  %1492 = vmatmul.msk.bf16.vlgmr.msra.gmra.mxu3 %vm166_vm11, %v1625_v28  ;;  %v735_v33 = vshll.u32 %v1625_v28, 16  ;;  %v847_v34 = vrot.slane %v1625_v28, 1  ;;  %v733_v20 = vshrl.u32 %v1625_v28, 16 }
 0x312   :  { %v731_v32 = vpack.c.b16 %v729_v31, %v729_v31 }
 0x313   :  { %v737_v36 = vrot.slane %v735_v33, 1 }
 0x314   :  { %v848_v35 = vrot.slane %v731_v32, 1  ;;  %v740_v37 = vshll.u32 %v731_v32, 16 }
 0x315   :  { %v738_v38 = vor.u32 %v737_v36, %v733_v20 }
 0x316   :  { %v849_v19 = vsel %vm244_vm12, %v847_v34, %v848_v35  ;;  %v742_v39 = vrot.slane %v740_v37, 1 }
 0x317   :  { %1518 = vmatmul.msk.bf16.vlgmr.msra.gmra.mxu0 %vm166_vm11, %v849_v19  ;;  %v1638_v52 = vld [vmem:[#allocation2 + $0xc] sm:$0xff] }
 0x318   :  { %v743_v40 = vsel %vm126_vm13, %v738_v38, %v742_v39  ;;  %v948_v42 = vld [vmem:[#allocation2 + $0x14] sm:$0x1]  ;;  %v978_v44 = vshll.u32 %v1638_v52, 16  ;;  %v976_v46 = vshrl.u32 %v1638_v52, 16  ;;  %v1089_v53 = vrot.slane %v1638_v52, 1 }
 0x319   :  { %1475 = vmatmul.msk.bf16.vlgmr.msra.gmra.mxu2 %vm166_vm11, %v743_v40  ;;  %v972_v43 = vunpack.c.l.b16 %v948_v42 }
 0x31a   :  { %v980_v47 = vrot.slane %v978_v44, 1 }
 0x31b   :  { %v974_v45 = vpack.c.b16 %v972_v43, %v972_v43 }
 0x31c   :  { %v981_v48 = vor.u32 %v980_v47, %v976_v46 }
 0x31d   :  { %v983_v49 = vshll.u32 %v974_v45, 16  ;;  %v1090_v50 = vrot.slane %v974_v45, 1 }
 0x31f   :  { %v985_v51 = vrot.slane %v983_v49, 1  ;;  %v1091_v55 = vsel %vm244_vm12, %v1089_v53, %v1090_v50 }
 0x321   :  { %v986_v54 = vsel %vm126_vm13, %v981_v48, %v985_v51  ;;  %1591 = vmatmul.msk.bf16.vlgmr.msrb.gmra.mxu3 %vm166_vm11, %v1091_v55 }
 0x322   :  { %1548 = vmatmul.msk.bf16.vlgmr.msra.gmra.mxu1 %vm166_vm11, %v986_v54 }
 0x329   :  { %1565 = vmatmul.msk.bf16.vlgmr.msrb.gmra.mxu2 %vm166_vm11, %v1638_v52 }
 0x394   :  { %v832_v56 = vpop.f32.mrf.mxu3  ;;  %v892_v57 = vpop.f32.mrf.mxu0 }
 0x39c   :  { %v786_v29 = vpop.f32.mrf.mxu2  ;;  %v834_v59 = vpop.f32.mrf.mxu3 }
 0x39d   :  { %v833_v58 = vadd.f32 %v832_v56, %v786_v29  ;;  %v894_v41 = vpop.f32.mrf.mxu0 }
 0x39f   :  { %v897_v27 = vadd.f32 %v892_v57, %v833_v58  ;;  %v1029_v62 = vpop.f32.mrf.mxu1 }
 0x3a1   :  { %899 = vst.msk [vmem:[#allocation3] sm:$0xff] %vm297_vm14, %v897_v27 }
 0x3a4   :  { %v788_v30 = vpop.f32.mrf.mxu2  ;;  %v1134_v2 = vpop.f32.mrf.mxu3 }
 0x3a5   :  { %v835_v60 = vadd.f32 %v834_v59, %v788_v30  ;;  %v1208_v59 = vld [vmem:[%s2179_s5] sm:$0x1] }
 0x3a7   :  { %v898_v61 = vadd.f32 %v894_v41, %v835_v60  ;;  %v1031_v9 = vpop.f32.mrf.mxu1  ;;  %v1226_v41 = vld [vmem:[%s2180_s6] sm:$0x1] }
 0x3a8   :  { %v2109_v17 = vld [vmem:[#allocation3] sm:$0xff] }
 0x3a9   :  { %900 = vst.msk [vmem:[#allocation3 + $0x8] sm:$0xff] %vm297_vm14, %v898_v61  ;;  %v1160_v5 = vmul.f32 %v2109_v17, %v2109_v17  ;;  %v1147_v21 = vsel %vm297_vm14, %v2109_v17, 0.0 }
 0x3ab   :  { %v1164_v23 = vsel %vm297_vm14, %v1160_v5, 0.0 }
 0x3ac   :  { %v1075_v4 = vpop.f32.mrf.mxu2  ;;  %v1136_v14 = vpop.f32.mrf.mxu3 }
 0x3ad   :  { %v1076_v6 = vadd.f32 %v1075_v4, %v1029_v62 }
 0x3af   :  { %v1139_v7 = vadd.f32 %v1134_v2, %v1076_v6 }
 0x3b0   :  { %v2107_v63 = vld [vmem:[#allocation3 + $0x8] sm:$0xff] }
 0x3b1   :  { %1141 = vst.msk [vmem:[#allocation3 + $0x10] sm:$0xff] %vm297_vm14, %v1139_v7  ;;  %v1161_v1 = vmul.f32 %v2107_v63, %v2107_v63  ;;  %v1148_v3 = vsel %vm297_vm14, %v2107_v63, 0.0 }
 0x3b2   :  { %v1149_v15 = vadd.f32 %v1148_v3, %v1147_v21 }
 0x3b3   :  { %v1165_v8 = vsel %vm297_vm14, %v1161_v1, 0.0 }
 0x3b4   :  { %v1077_v11 = vpop.f32.mrf.mxu2  ;;  %v1166_v12 = vadd.f32 %v1165_v8, %v1164_v23 }
 0x3b5   :  { %v1078_v13 = vadd.f32 %v1077_v11, %v1031_v9 }
 0x3b7   :  { %v1140_v16 = vadd.f32 %v1136_v14, %v1078_v13 }
 0x3b8   :  { %v2111_v0 = vld [vmem:[#allocation3 + $0x10] sm:$0xff] }
 0x3b9   :  { %1142 = vst.msk [vmem:[#allocation3 + $0x18] sm:$0xff] %vm297_vm14, %v1140_v16  ;;  %v1162_v18 = vmul.f32 %v2111_v0, %v2111_v0  ;;  %v1150_v22 = vsel %vm297_vm14, %v2111_v0, 0.0 }
 0x3ba   :  { %v1151_v10 = vadd.f32 %v1150_v22, %v1149_v15  ;;  %v1268_v15 = vld [vmem:[%s2172_s0] sm:$0xff] }
 0x3bb   :  { %v1167_v24 = vsel %vm297_vm14, %v1162_v18, 0.0 }
 0x3bc   :  { %v1168_v32 = vadd.f32 %v1167_v24, %v1166_v12 }
 0x3c0   :  { %v1146_v25 = vld [vmem:[#allocation3 + $0x18] sm:$0xff] }
 0x3c1   :  { %v1152_v26 = vsel %vm297_vm14, %v1146_v25, 0.0  ;;  %v1163_v28 = vmul.f32 %v1146_v25, %v1146_v25 }
 0x3c2   :  { %v1153_v31 = vadd.f32 %v1152_v26, %v1151_v10  ;;  %v1596_v10 = vld [vmem:[%s2172_s0 + $0x18] sm:$0xff] }
 0x3c3   :  { %v1169_v33 = vsel %vm297_vm14, %v1163_v28, 0.0 }
 0x3c4   :  { %v1154_v34 = vrot.slane %v1153_v31, 4  ;;  %v1170_v35 = vadd.f32 %v1169_v33, %v1168_v32 }
 0x3c6   :  { %v1155_v20 = vadd.f32 %v1154_v34, %v1153_v31  ;;  %v1171_v36 = vrot.slane %v1170_v35, 4 }
 0x3c8   :  { %v1156_v37 = vrot.slane %v1155_v20, 2  ;;  %v1172_v19 = vadd.f32 %v1171_v36, %v1170_v35 }
 0x3ca   :  { %v1157_v38 = vadd.f32 %v1156_v37, %v1155_v20  ;;  %v1173_v39 = vrot.slane %v1172_v19, 2 }
 0x3cc   :  { %v1158_v52 = vrot.slane %v1157_v38, 1  ;;  %v1174_v40 = vadd.f32 %v1173_v39, %v1172_v19 }
 0x3ce   :  { %v1175_v42 = vrot.slane %v1174_v40, 1  ;;  %v1159_v43 = vadd.f32 %v1158_v52, %v1157_v38 }
 0x3d0   :  { %v1176_v44 = vadd.f32 %v1175_v42, %v1174_v40 }
 0x3d2   :  { %v1177_v45 = vsel %vm571_vm15, %v1159_v43, %v1176_v44 }
 0x3d3   :  { %1592 = vmatmul.msk.f32.vlgmr.msrb.gmra.mxu0 %vm297_vm14, %v1177_v45 }
 0x450   :  { %v1198_v46 = vpop.f32.mrf.mxu0 }
 0x451   :  { %v1201_v47 = vmul.f32 0.001953125, %v1198_v46 }
 0x453   :  { %v1202_v48 = vmul.f32 %v1201_v47, %v1201_v47 }
 0x455   :  { %v1204_v49 = vrot.slane %v1202_v48, 7 }
 0x457   :  { %v1206_v50 = vsub.f32 %v1201_v47, %v1204_v49 }
 0x459   :  { %v1207_v51 = vmax.f32 %v1206_v50, 0.0 }
 0x45b   :  { %v1209_v53 = vadd.f32 1e-05, %v1207_v51 }
 0x45d   :  { %1655 = vrsqrt.f32 %v1209_v53  ;;  %vm1216_vm4 = vweird.f32 %v1209_v53 }
 0x463   :  { %v1656_v54 = vpop.eup %1655 }
 0x464   :  { %v1211_v55 = vmul.f32 %v1656_v54, %v1209_v53  ;;  %vm1217_vm3 = vweird.f32 %v1656_v54 }
 0x465   :  { %vm1218_vm6 = vmor %vm1216_vm4, %vm1217_vm3 }
 0x466   :  { %v1212_v56 = vmul.f32 %v1656_v54, %v1211_v55 }
 0x468   :  { %v1213_v57 = vmul.f32 0.5, %v1212_v56 }
 0x46a   :  { %v1214_v29 = vsub.f32 1.5, %v1213_v57 }
 0x46c   :  { %v1215_v58 = vmul.f32 %v1656_v54, %v1214_v29 }
 0x46e   :  { %v1219_v27 = vsel %vm1218_vm6, %v1656_v54, %v1215_v58 }
 0x46f   :  { %1221 = vst [vmem:[#allocation1] sm:$0xff] %v1219_v27 }
 0x476   :  { %v1223_v30 = vld [vmem:[#allocation1 + $0x1] ss:$9 sm:$0xff] }
 0x477   :  { %v1225_v60 = vmul.f32 %v1223_v30, %v1208_v59 }
 0x479   :  { %v1227_v61 = vmul.f32 %v1225_v60, %v1201_v47 }
 0x47b   :  { %v1228_v62 = vsub.f32 %v1226_v41, %v1227_v61 }
 0x47d   :  { %v1230_v2 = vperm.slane %v1228_v62, 0 }
 0x47f   :  { %v1232_v4 = vsel %vm571_vm15, %v1225_v60, %v1230_v2 }
 0x480   :  { %1594 = vmatmul.msk.f32.vlgmr.msrb.gmra.mxu1 %vm628_vm5, %v1232_v4 }
 0x4fd   :  { %v1253_v6 = vpop.f32.mrf.mxu1 }
 0x4fe   :  { %v1258_v7 = vperm.slane %v1253_v6, 0  ;;  %v1261_v9 = vperm.slane %v1253_v6, 1 }
 0x500   :  { %v1259_v11 = vmul.f32 %v1258_v7, %v2109_v17  ;;  %v1260_v13 = vmul.f32 %v1258_v7, %v2107_v63  ;;  %v1276_v14 = vmul.f32 %v1258_v7, %v2111_v0  ;;  %v1277_v16 = vmul.f32 %v1258_v7, %v1146_v25  ;;  %v1269_v17 = vld [vmem:[%s2172_s0 + $0x8] sm:$0xff]  ;;  %v1595_v63 = vld [vmem:[%s2172_s0 + $0x10] sm:$0xff] }
 0x502   :  { %v1262_v1 = vadd.f32 %v1261_v9, %v1259_v11  ;;  %v1263_v3 = vadd.f32 %v1261_v9, %v1260_v13  ;;  %v1278_v5 = vadd.f32 %v1276_v14, %v1261_v9  ;;  %v1279_v18 = vadd.f32 %v1277_v16, %v1261_v9 }
 0x504   :  { %v1264_v21 = vmul.f32 0.02, %v1262_v1  ;;  %v1265_v22 = vmul.f32 0.02, %v1263_v3  ;;  %v1280_v8 = vmul.f32 0.02, %v1278_v5 }
 0x505   :  { %v1281_v23 = vmul.f32 0.02, %v1279_v18 }
 0x506   :  { %v1266_v0 = vmax.f32 %v1262_v1, %v1264_v21  ;;  %v1267_v24 = vmax.f32 %v1263_v3, %v1265_v22  ;;  %v1282_v25 = vmax.f32 %v1278_v5, %v1280_v8 }
 0x507   :  { %v1283_v12 = vmax.f32 %v1279_v18, %v1281_v23 }
 0x508   :  { %v1270_v26 = vadd.f32 %v1268_v15, %v1266_v0  ;;  %v1271_v28 = vadd.f32 %v1269_v17, %v1267_v24  ;;  %v1286_v31 = vadd.f32 %v1595_v63, %v1282_v25 }
 0x509   :  { %v1287_v32 = vadd.f32 %v1596_v10, %v1283_v12 }
 0x50a   :  { %1272 = vst.msk [vmem:[%s2181_s9] sm:$0xff] %vm297_vm14, %v1270_v26 }
 0x50b   :  { %1273 = vst.msk [vmem:[%s2181_s9 + $0x8] sm:$0xff] %vm297_vm14, %v1271_v28 }
 0x50c   :  { %1597 = vst.msk [vmem:[%s2181_s9 + $0x10] sm:$0xff] %vm297_vm14, %v1286_v31 }
 0x50d   :  { %1598 = vst.msk [vmem:[%s2181_s9 + $0x18] sm:$0xff] %vm297_vm14, %v1287_v32 }

</bundles_post_ra>
